<compile_context>
chip_gen: v6e
topology: v6e:2x2x1
jax: 0.10.0
libtpu: 0.0.40
codegen_flags: <defaults>
</compile_context>

<pallas_src>
import jax
import jax.numpy as jnp
from jax.experimental import pallas as pl
from jax.experimental.pallas import tpu as pltpu  # noqa: F401  (TPU backend registration)

# ----------------------------- configuration --------------------------------
B = 2             # batch_size
CA_NODES = 8      # nodes per sample in the CA graph
MP_NODES = 16     # nodes per sample in the MP graph
MPS = MP_NODES - CA_NODES
K = 4             # top-k pooled nodes per graph
TS = 8            # t_size (time embedding width, even)
GH = TS // 2
FEAT0 = 16        # feat_0
FEAT1 = 4         # feat_1
MULT = 2          # stride // 2
F0M = FEAT0 * MULT            # 32
F1M = FEAT1 * MULT            # 8
F0_START, F1_START = 12, 2    # fiber_start = {0: 12, 1: 2}
PRE_LIN1 = 36                 # pre_linear fiber {1: 36}
OUT1 = 2                      # fiber_out {1: 2}
LATENT = FEAT0 * MULT * MULT  # latent_size = 64

W_LANES = 128                 # weight-slab lane width (one unmasked DMA)


# ----------------------- static weight-slab layout ---------------------------
def _round8(n):
    return (n + 7) & ~7


_LAYOUT_ENTRIES = [
    ("gfp_w", 1, GH),
    ("t_ws", GH, TS + 1), ("t_wc", GH, TS + 1), ("t_b", 1, TS + 1),
    ("w_t_all", TS, FEAT0 + 2 * F0M),
    ("w_dca0", F0_START, FEAT0), ("b_dca0", 1, FEAT0),
    ("w_c2m0", FEAT0, F0M), ("b_c2m0", 1, F0M),
    ("w_tk0", F0M, F0M), ("b_tk0", 1, F0M),
    ("w_tkp", F0M, LATENT), ("b_tkp", 1, LATENT),
    ("w_dg00", LATENT, LATENT), ("b_dg00", 1, LATENT),
    ("w_gp", LATENT, LATENT), ("b_gp", 1, LATENT),
    ("w_lu", LATENT, LATENT), ("b_lu", 1, LATENT),
    ("w_ug0", LATENT, LATENT), ("b_ug0", 1, LATENT),
    ("w_ugm0a", LATENT, F0M), ("w_ugm0b", F0M, F0M), ("b_ugm0", 1, F0M),
    ("w_uo0", F0M, FEAT0), ("b_uo0", 1, FEAT0),
    ("w_dca1_bd", 3 * F1_START, 3 * FEAT1),
    ("w_c2m1_bd", 3 * FEAT1, 3 * F1M),
    ("w_tk1_bd", 3 * F1M, 3 * F1M),
    ("w_dg1f", LATENT, 3 * F1M),
    ("w_ugm1b_bd", 3 * F1M, 3 * F1M),
    ("w_uo1_bd", 3 * F1M, 3 * FEAT1),
    ("w_fin_f_bd", 3 * FEAT1, 3 * OUT1),
]
_LAYOUT = {}
_off = 0
for _name, _r, _c in _LAYOUT_ENTRIES:
    assert _c <= W_LANES
    _LAYOUT[_name] = (_off, _r, _c)
    _off += _round8(_r)
W_ROWS = _off  # multiple of 8 by construction


# ------------------------------ small helpers --------------------------------
def _silu(y):
    # Exact sigmoid (divide); EUP-approx reciprocal deliberately not used so the
    # validation tolerance stays robust — this is off the matmul critical path.
    return y * (1.0 / (1.0 + jnp.exp(-y)))


def _addg(base, term, n):
    """Add a per-graph row `term` (B, C) to a b-major (B*n, C) slab."""
    Bv, C = term.shape
    return (base.reshape(Bv, n, C) + term.reshape(Bv, 1, C)).reshape(Bv * n, C)


def _scaleg(x, e1, n):
    """Scale a b-major (B*n, C) slab by the per-graph scalar e1 (B, 1)."""
    Bv = e1.shape[0]
    C = x.shape[-1]
    return (x.reshape(Bv, n, C) * e1.reshape(Bv, 1, 1)).reshape(Bv * n, C)


# --------------------------- fused forward kernel ----------------------------
def _fused_kernel(t_ref, nf0_ref, nf1_ref, mp0_ref, mp1_ref, w_ref,
                  o1_ref, nfin0_ref, uo0_ref, uo1_ref):
    def W(name):  # load a weight at its point of use (static, tile-aligned slice)
        r0, r, c = _LAYOUT[name]
        return w_ref[r0:r0 + r, :c]

    def mm(a, b):
        return jnp.dot(a, b, preferred_element_type=jnp.float32)

    # ---- embed_t: GaussianFourierProjection + linear0/linear1 + SiLU (all graphs) ----
    xp = t_ref[...] * W("gfp_w") * (2.0 * jnp.pi)                         # (B, GH)
    sn, cs = jnp.sin(xp), jnp.cos(xp)
    emb = _silu(mm(sn, W("t_ws")) + mm(cs, W("t_wc")) + W("t_b"))         # (B, TS+1)
    e0, e1 = emb[:, :TS], emb[:, TS:TS + 1]
    # Per-graph t contributions of the three t-concat stages: one fused matmul.
    te = mm(e0, W("w_t_all"))                                             # (B, 80)
    te_dca = te[:, :FEAT0] + W("b_dca0")
    te_c2m = te[:, FEAT0:FEAT0 + F0M] + W("b_c2m0")
    te_tk = te[:, FEAT0 + F0M:] + W("b_tk0")

    # ---- down_ca on the CA graph (concat_t folded into split weight + row add) ----
    x0 = _silu(_addg(mm(nf0_ref[...], W("w_dca0")), te_dca, CA_NODES))    # (B*CA, 16)
    x1 = mm(_scaleg(nf1_ref[...], e1, CA_NODES), W("w_dca1_bd"))          # (B*CA, 12)

    # ---- down_ca2mp: only the MP-only rows feed anything downstream ----
    mp_out0 = _silu(_addg(mm(mp0_ref[...], W("w_c2m0")), te_c2m, MPS))    # (B*MPS, 32)
    mp_out1 = mm(_scaleg(mp1_ref[...], e1, MPS), W("w_c2m1_bd"))          # (B*MPS, 24)

    # ---- mp_topk transformer surrogate ----
    tk0 = _silu(_addg(mm(mp_out0, W("w_tk0")), te_tk, MPS))               # (B*MPS, 32)
    tk1 = mm(_scaleg(mp_out1, e1, MPS), W("w_tk1_bd"))                    # (B*MPS, 24)

    # ---- top-k node selection as a {0,1} mask, vectorized over the batch ----
    scores = jnp.sum(tk0, axis=1, keepdims=True).reshape(B, MPS, 1)
    idx = jax.lax.broadcasted_iota(jnp.int32, (B, MPS, 1), 1).astype(jnp.float32)
    masked = scores
    sel = jnp.zeros((B, MPS, 1), jnp.float32)
    for _ in range(K):  # matches lax.top_k tie-breaking (first occurrence of max)
        mx = jnp.max(masked, axis=1, keepdims=True)
        eq = masked == mx
        first = jnp.min(jnp.where(eq, idx, float(MPS)), axis=1, keepdims=True)
        oh = jnp.where(idx == first, 1.0, 0.0)
        sel = jnp.maximum(sel, oh)
        masked = jnp.where(oh > 0.0, -jnp.inf, masked)
    sel_rows = sel.reshape(B * MPS, 1)

    # ---- gather -> small-graph GCN stack -> scatter, in place under `sel` ----
    proj = _silu(mm(tk0, W("w_tkp")) + W("b_tkp"))                        # (B*MPS, 64)
    dg0 = _silu(mm(proj, W("w_dg00")) + W("b_dg00"))                      # down_gcn deg-0
    dgp = _silu(mm(dg0, W("w_gp")) + W("b_gp"))                           # down_gcn2pool
    pooled = jnp.sum((sel_rows * dgp).reshape(B, MPS, LATENT), axis=1) * (1.0 / K)
    lat = _silu(mm(pooled, W("w_lu")) + W("b_lu"))                        # Latent_Unpool
    up0 = _silu(mm(_addg(dg0, lat, MPS), W("w_ug0")) + W("b_ug0"))        # up_gcn deg-0

    # ---- up_gcn_mp (Unpool_Layer channel concat folded into split / fused weights) ----
    um0 = _silu(mm(sel_rows * up0, W("w_ugm0a")) + mm(tk0, W("w_ugm0b")) + W("b_ugm0"))
    # deg-1: down_gcn(w01) -> up_gcn -> scatter -> up_gcn_mp fused into one weight;
    # the row mask `sel` commutes with right-multiplication.
    um1 = sel_rows * mm(proj, W("w_dg1f")) + mm(tk1, W("w_ugm1b_bd"))     # (B*MPS, 24)

    off0 = um0 + mp_out0
    off1 = um1 + mp_out1

    # ---- up_off_mp on the MP-only rows (exported for validation) ----
    uo0_ref[...] = _silu(mm(off0, W("w_uo0")) + W("b_uo0"))               # (B*MPS, 16)
    uo1_ref[...] = mm(off1, W("w_uo1_bd"))                                # (B*MPS, 12)

    # CA rows were zero-filled by unpool_layer_off_mp: deg-0 only sees the bias and
    # deg-1 is exactly zero, so node_final deg-1 == x1 (no zero matmuls emitted).
    # TODO(synk): real SE3 message passing on b_graph_mpRev would propagate off0/off1
    #             back into the CA rows; the row-wise surrogate cannot.
    nfin0_ref[...] = x0 + _silu(W("b_uo0"))                               # (B*CA, 16)

    # ---- up_ca + final LinearSE3: purely-linear deg-1 chain pre-fused ----
    o1_ref[...] = mm(_scaleg(x1, e1, CA_NODES), W("w_fin_f_bd"))          # (B*CA, 6)


# ---------------------------- weight packing ----------------------------------
def _bd3(w):
    """Block-diagonal of 3 copies: (cin, cout) -> (3*cin, 3*cout)."""
    w = w.astype(jnp.float32)
    cin, cout = w.shape
    out = jnp.zeros((3 * cin, 3 * cout), jnp.float32)
    for m in range(3):
        out = out.at[m * cin:(m + 1) * cin, m * cout:(m + 1) * cout].set(w)
    return out


def _pack_weights(p):
    hi = jax.lax.Precision.HIGHEST
    te = p["t_embed"]
    w_dca0_full, b_dca0 = p["down_ca"]["0"]
    w_c2m0_full, b_c2m0 = p["down_ca2mp"]["0"]
    w_tk0_full, b_tk0 = p["mp_topk"]["0"]
    dgn = p["down_gcn"]
    w_ugm0_full, b_ugm0 = p["up_gcn_mp"]["0"]
    w_ugm1 = p["up_gcn_mp"]["1"]

    vals = {
        "gfp_w": te["gfp_w"],
        "t_ws": jnp.concatenate([te["w0"][:GH], te["w1"][:GH]], axis=1),
        "t_wc": jnp.concatenate([te["w0"][GH:], te["w1"][GH:]], axis=1),
        "t_b": jnp.concatenate([te["b0"], te["b1"]], axis=1),
        "w_t_all": jnp.concatenate(
            [w_dca0_full[:TS], w_c2m0_full[:TS], w_tk0_full[:TS]], axis=1),
        "w_dca0": w_dca0_full[TS:], "b_dca0": b_dca0,
        "w_c2m0": w_c2m0_full[TS:], "b_c2m0": b_c2m0,
        "w_tk0": w_tk0_full[TS:], "b_tk0": b_tk0,
        "w_tkp": p["topk_proj"][0], "b_tkp": p["topk_proj"][1],
        "w_dg00": dgn["w00"], "b_dg00": dgn["b00"],
        "w_gp": p["down_gcn2pool"][0], "b_gp": p["down_gcn2pool"][1],
        "w_lu": p["lat_unpool"][0], "b_lu": p["lat_unpool"][1],
        "w_ug0": p["up_gcn"]["0"][0], "b_ug0": p["up_gcn"]["0"][1],
        "w_ugm0a": w_ugm0_full[:LATENT], "w_ugm0b": w_ugm0_full[LATENT:],
        "b_ugm0": b_ugm0,
        "w_uo0": p["up_off_mp"]["0"][0], "b_uo0": p["up_off_mp"]["0"][1],
        "w_dca1_bd": _bd3(p["down_ca"]["1"]),
        "w_c2m1_bd": _bd3(p["down_ca2mp"]["1"]),
        "w_tk1_bd": _bd3(p["mp_topk"]["1"]),
        "w_ugm1b_bd": _bd3(w_ugm1[F1M:]),
        "w_uo1_bd": _bd3(p["up_off_mp"]["1"]),
    }
    # Purely-linear deg-1 chains pre-fused (tiny one-off dots, done in the wrapper).
    w01_cat = jnp.concatenate([dgn["w01"][m] for m in range(3)], axis=1)    # (64, 24)
    vals["w_dg1f"] = jnp.dot(
        jnp.dot(w01_cat, _bd3(p["up_gcn"]["1"]), precision=hi),
        _bd3(w_ugm1[:F1M]), precision=hi)
    vals["w_fin_f_bd"] = _bd3(jnp.dot(p["up_ca"]["1"], p["final"]["1"], precision=hi))

    slab = jnp.zeros((W_ROWS, W_LANES), jnp.float32)
    for name, (r0, r, c) in _LAYOUT.items():
        v = vals[name].astype(jnp.float32)
        assert v.shape == (r, c), (name, v.shape, (r, c))
        slab = slab.at[r0:r0 + r, :c].set(v)
    return slab


# ------------------------------- wrappers -------------------------------------
def _forward_impl(params, nf, nf_mp, batched_t):
    wslab = _pack_weights(params)

    t2 = batched_t.reshape(B, 1).astype(jnp.float32)
    nf0 = nf["0"][..., 0].astype(jnp.float32)                                  # (B*CA, 12)
    nf1w = jnp.transpose(nf["1"].astype(jnp.float32), (0, 2, 1)) \
              .reshape(B * CA_NODES, 3 * F1_START)                             # (B*CA, 6)
    mp0 = nf_mp["0"][..., 0].astype(jnp.float32) \
              .reshape(B, MP_NODES, FEAT0)[:, CA_NODES:].reshape(B * MPS, FEAT0)
    mp1 = nf_mp["1"].astype(jnp.float32) \
              .reshape(B, MP_NODES, FEAT1, 3)[:, CA_NODES:].reshape(B * MPS, FEAT1, 3)
    mp1w = jnp.transpose(mp1, (0, 2, 1)).reshape(B * MPS, 3 * FEAT1)           # (B*MPS, 12)

    out_shapes = (
        jax.ShapeDtypeStruct((B * CA_NODES, 3 * OUT1), jnp.float32),   # final deg-1 (wide)
        jax.ShapeDtypeStruct((B * CA_NODES, FEAT0), jnp.float32),      # node_final_ca deg-0
        jax.ShapeDtypeStruct((B * MPS, FEAT0), jnp.float32),           # up_off_mp deg-0 (MP rows)
        jax.ShapeDtypeStruct((B * MPS, 3 * FEAT1), jnp.float32),       # up_off_mp deg-1 (wide)
    )
    o1w, nfin0, uo0, uo1w = pl.pallas_call(
        _fused_kernel, out_shape=out_shapes,
    )(t2, nf0, nf1w, mp0, mp1w, wslab)

    out = {"1": jnp.transpose(o1w.reshape(B * CA_NODES, 3, OUT1), (0, 2, 1))}
    aux = {"node_final_0": nfin0,
           "up_off_mp_0": uo0,
           "up_off_mp_1": jnp.transpose(uo1w.reshape(B * MPS, 3, FEAT1), (0, 2, 1))}
    return out, aux


graph_unet_forward_with_aux = jax.jit(_forward_impl)


def graph_unet_forward(params, nf, nf_mp, batched_t):
    return graph_unet_forward_with_aux(params, nf, nf_mp, batched_t)[0]


# --------------------------- pure-JAX reference --------------------------------
def _reference_impl(params, nf, nf_mp, batched_t):
    p = params
    hi = jax.lax.Precision.HIGHEST

    def dot(a, b):
        return jnp.dot(a, b, precision=hi)

    def deg1_lin(x, w):  # (N, Cin, 3) @ (Cin, Cout) -> (N, Cout, 3)
        return jnp.einsum("ncm,cd->ndm", x, w, precision=hi)

    t = batched_t.reshape(B, 1).astype(jnp.float32)
    xp = t * p["t_embed"]["gfp_w"] * (2.0 * jnp.pi)
    sc = jnp.concatenate([jnp.sin(xp), jnp.cos(xp)], axis=1)
    e0 = _silu(dot(sc, p["t_embed"]["w0"]) + p["t_embed"]["b0"])
    e1 = _silu(dot(sc, p["t_embed"]["w1"]) + p["t_embed"]["b1"])

    def concat_t0(f0):
        L = f0.shape[0] // B
        return jnp.concatenate([jnp.repeat(e0, L, axis=0), f0], axis=1)

    def scale_t1(f1):
        L = f1.shape[0] // B
        return f1 * jnp.repeat(e1, L, axis=0)[:, :, None]

    nf0, nf1 = nf["0"][..., 0], nf["1"]
    mp0_in, mp1_in = nf_mp["0"][..., 0], nf_mp["1"]

    w, bias = p["down_ca"]["0"]
    x0 = _silu(dot(concat_t0(nf0), w) + bias)
    x1 = deg1_lin(scale_t1(nf1), p["down_ca"]["1"])

    cat0 = jnp.concatenate(
        [x0.reshape(B, CA_NODES, FEAT0),
         mp0_in.reshape(B, MP_NODES, FEAT0)[:, CA_NODES:]], axis=1
    ).reshape(B * MP_NODES, FEAT0)
    cat1 = jnp.concatenate(
        [x1.reshape(B, CA_NODES, FEAT1, 3),
         mp1_in.reshape(B, MP_NODES, FEAT1, 3)[:, CA_NODES:]], axis=1
    ).reshape(B * MP_NODES, FEAT1, 3)

    w, bias = p["down_ca2mp"]["0"]
    c2m0 = _silu(dot(concat_t0(cat0), w) + bias)
    c2m1 = deg1_lin(scale_t1(cat1), p["down_ca2mp"]["1"])

    mp_out0 = c2m0.reshape(B, MP_NODES, F0M)[:, CA_NODES:].reshape(B * MPS, F0M)
    mp_out1 = c2m1.reshape(B, MP_NODES, F1M, 3)[:, CA_NODES:].reshape(B * MPS, F1M, 3)

    w, bias = p["mp_topk"]["0"]
    tk0 = _silu(dot(concat_t0(mp_out0), w) + bias)
    tk1 = deg1_lin(scale_t1(mp_out1), p["mp_topk"]["1"])

    scores = jnp.sum(tk0, axis=-1).reshape(B, MPS)
    _, idx = jax.lax.top_k(scores, K)
    topk_indx = (idx + (jnp.arange(B) * MPS)[:, None]).reshape(-1)

    w, bias = p["topk_proj"]
    proj = _silu(dot(tk0[topk_indx], w) + bias)

    dgn = p["down_gcn"]
    dg0 = _silu(dot(proj, dgn["w00"]) + dgn["b00"])
    dg1 = jnp.stack([dot(proj, dgn["w01"][m]) for m in range(3)], axis=-1)

    w, bias = p["down_gcn2pool"]
    dgp = _silu(dot(dg0, w) + bias)
    pooled = jnp.mean(dgp.reshape(B, K, LATENT), axis=1)
    w, bias = p["lat_unpool"]
    lat = _silu(dot(pooled, w) + bias)
    lat_unp0 = dg0 + jnp.repeat(lat, K, axis=0)

    w, bias = p["up_gcn"]["0"]
    up0 = _silu(dot(lat_unp0, w) + bias)
    up1 = deg1_lin(dg1, p["up_gcn"]["1"])

    scat0 = jnp.zeros((B * MPS, LATENT), jnp.float32).at[topk_indx].set(up0)
    scat1 = jnp.zeros((B * MPS, F1M, 3), jnp.float32).at[topk_indx].set(up1)

    w, bias = p["up_gcn_mp"]["0"]
    um0 = _silu(dot(jnp.concatenate([scat0, tk0], axis=1), w) + bias)
    um1 = deg1_lin(jnp.concatenate([scat1, tk1], axis=1), p["up_gcn_mp"]["1"])

    off0, off1 = um0 + mp_out0, um1 + mp_out1

    mp_idx = (jnp.arange(B)[:, None] * MP_NODES
              + jnp.arange(CA_NODES, MP_NODES)[None, :]).reshape(-1)
    unp0 = jnp.zeros((B * MP_NODES, F0M), jnp.float32).at[mp_idx].set(off0)
    unp1 = jnp.zeros((B * MP_NODES, F1M, 3), jnp.float32).at[mp_idx].set(off1)

    w, bias = p["up_off_mp"]["0"]
    uo0 = _silu(dot(unp0, w) + bias)
    uo1 = deg1_lin(unp1, p["up_off_mp"]["1"])

    inv_mp_idx = (jnp.arange(B)[:, None] * MP_NODES
                  + jnp.arange(CA_NODES)[None, :]).reshape(-1)
    nfin0 = uo0[inv_mp_idx] + x0
    nfin1 = uo1[inv_mp_idx] + x1

    pre1 = deg1_lin(scale_t1(nfin1), p["up_ca"]["1"])
    out1 = deg1_lin(pre1, p["final"]["1"])

    aux = {"node_final_0": nfin0,
           "up_off_mp_0": uo0[mp_idx],
           "up_off_mp_1": uo1[mp_idx]}
    return {"1": out1}, aux


reference_forward_with_aux = jax.jit(_reference_impl)


# ------------------------------- parameters ------------------------------------
def build_params(key):
    ks = jax.random.split(key, 24)

    def init(k, shape, scale=0.1):
        return scale * jax.random.normal(k, shape, dtype=jnp.float32)

    def z(*s):
        return jnp.zeros(s, jnp.float32)

    p = {}
    p["t_embed"] = {"gfp_w": 30.0 * jax.random.normal(ks[0], (1, GH), jnp.float32),
                    "w0": init(ks[1], (TS, TS)), "b0": z(1, TS),
                    "w1": init(ks[2], (TS, 1)), "b1": z(1, 1)}
    p["down_ca"] = {"0": (init(ks[3], (TS + F0_START, FEAT0)), z(1, FEAT0)),
                    "1": init(ks[4], (F1_START, FEAT1))}
    p["down_ca2mp"] = {"0": (init(ks[5], (TS + FEAT0, F0M)), z(1, F0M)),
                       "1": init(ks[6], (FEAT1, F1M))}
    p["mp_topk"] = {"0": (init(ks[7], (TS + F0M, F0M)), z(1, F0M)),
                    "1": init(ks[8], (F1M, F1M))}
    p["topk_proj"] = (init(ks[9], (F0M, LATENT)), z(1, LATENT))
    kk = jax.random.split(ks[10], 3)
    p["down_gcn"] = {"w00": init(ks[11], (LATENT, LATENT)), "b00": z(1, LATENT),
                     "w01": tuple(init(kk[m], (LATENT, F1M)) for m in range(3))}
    p["down_gcn2pool"] = (init(ks[12], (LATENT, LATENT)), z(1, LATENT))
    p["lat_unpool"] = (init(ks[13], (LATENT, LATENT)), z(1, LATENT))
    p["up_gcn"] = {"0": (init(ks[14], (LATENT, LATENT)), z(1, LATENT)),
                   "1": init(ks[15], (F1M, F1M))}
    p["up_gcn_mp"] = {"0": (init(ks[16], (LATENT + F0M, F0M)), z(1, F0M)),
                      "1": init(ks[17], (2 * F1M, F1M))}
    p["up_off_mp"] = {"0": (init(ks[18], (F0M, FEAT0)), z(1, FEAT0)),
                      "1": init(ks[19], (F1M, FEAT1))}
    p["up_ca"] = {"1": init(ks[20], (FEAT1, PRE_LIN1))}
    # LinearSE3 final layer; zero_lin=True -> weights['1'] zero-initialized
    p["final"] = {"1": jnp.zeros((PRE_LIN1, OUT1), jnp.float32)}
    return p


# ---------------------------------- main ----------------------------------------
if __name__ == "__main__":
    key = jax.random.PRNGKey(0)
    k_params, k_nf0, k_nf1, k_mp0, k_mp1, k_t, k_fin = jax.random.split(key, 7)

    params = build_params(k_params)
    nf = {"0": jax.random.normal(k_nf0, (B * CA_NODES, F0_START, 1), jnp.float32),
          "1": jax.random.normal(k_nf1, (B * CA_NODES, F1_START, 3), jnp.float32)}
    nf_mp = {"0": jax.random.normal(k_mp0, (B * MP_NODES, FEAT0, 1), jnp.float32),
             "1": jax.random.normal(k_mp1, (B * MP_NODES, FEAT1, 3), jnp.float32)}
    batched_t = jax.random.uniform(k_t, (B,), jnp.float32)

    # Validation: nonzero final LinearSE3 weights, compare fused kernel vs pure-JAX
    # reference (final output + deep intermediates exercising every stage/weight).
    params_val = dict(params)
    params_val["final"] = {"1": 0.1 * jax.random.normal(k_fin, (PRE_LIN1, OUT1),
                                                        jnp.float32)}
    out_p, aux_p = graph_unet_forward_with_aux(params_val, nf, nf_mp, batched_t)
    out_r, aux_r = reference_forward_with_aux(params_val, nf, nf_mp, batched_t)
    jax.block_until_ready(out_p["1"])

    tol = dict(rtol=5e-3, atol=5e-3)
    assert bool(jnp.allclose(out_p["1"], out_r["1"], **tol)), \
        float(jnp.max(jnp.abs(out_p["1"] - out_r["1"])))
    for name in sorted(aux_r):
        assert bool(jnp.allclose(aux_p[name], aux_r[name], **tol)), \
            (name, float(jnp.max(jnp.abs(aux_p[name] - aux_r[name]))))

    # Reference configuration: zero_lin=True zero-initializes the final LinearSE3
    # degree-1 weights, so the module's forward output is exactly zero.
    out = graph_unet_forward(params, nf, nf_mp, batched_t)
    out1 = jax.block_until_ready(out["1"])
    assert out1.shape == (B * CA_NODES, OUT1, 3), out1.shape
    assert bool(jnp.all(jnp.isfinite(out1)))
    assert bool(jnp.allclose(out1, 0.0))
    print("KERNEL_OK")
</pallas_src>

<mosaic_0001>
module attributes {stable_mosaic.version = 11 : i64} {
  func.func @_fused_kernel(%arg0: memref<2x1xf32, #tpu.memory_space<vmem>>, %arg1: memref<16x12xf32, #tpu.memory_space<vmem>>, %arg2: memref<16x6xf32, #tpu.memory_space<vmem>>, %arg3: memref<16x16xf32, #tpu.memory_space<vmem>>, %arg4: memref<16x12xf32, #tpu.memory_space<vmem>>, %arg5: memref<776x128xf32, #tpu.memory_space<vmem>>, %arg6: memref<16x6xf32, #tpu.memory_space<vmem>>, %arg7: memref<16x16xf32, #tpu.memory_space<vmem>>, %arg8: memref<16x16xf32, #tpu.memory_space<vmem>>, %arg9: memref<16x12xf32, #tpu.memory_space<vmem>>) attributes {dimension_semantics = [], scalar_prefetch = 0 : i64, scratch_operands = 0 : i64, tpu.core_type = #tpu.core_type<tc>} {
    %c0 = arith.constant 0 : index
    %c0_0 = arith.constant 0 : index
    %0 = vector.load %arg0[%c0, %c0_0] : memref<2x1xf32, #tpu.memory_space<vmem>>, vector<2x1xf32>
    %c0_1 = arith.constant 0 : index
    %c0_2 = arith.constant 0 : index
    %1 = vector.load %arg5[%c0_1, %c0_2] : memref<776x128xf32, #tpu.memory_space<vmem>>, vector<1x4xf32>
    %2 = vector.broadcast %0 : vector<2x1xf32> to vector<2x4xf32>
    %3 = vector.broadcast %1 : vector<1x4xf32> to vector<2x4xf32>
    %4 = arith.mulf %2, %3 : vector<2x4xf32>
    %cst = arith.constant 6.28318548 : f32
    %5 = vector.broadcast %cst : f32 to vector<2x4xf32>
    %6 = arith.mulf %4, %5 : vector<2x4xf32>
    %7 = math.sin %6 : vector<2x4xf32>
    %8 = math.cos %6 : vector<2x4xf32>
    %c8 = arith.constant 8 : index
    %c0_3 = arith.constant 0 : index
    %9 = vector.load %arg5[%c8, %c0_3] : memref<776x128xf32, #tpu.memory_space<vmem>>, vector<4x9xf32>
    %cst_4 = arith.constant dense<0.000000e+00> : vector<2x9xf32>
    %10 = tpu.matmul %7, %9, %cst_4 {dimension_numbers = #tpu.dot_dimension_numbers<[1], [0], [0], [1], [0, 0, 1, 1], [], []>} : vector<2x4xf32>, vector<4x9xf32>, vector<2x9xf32> -> vector<2x9xf32>
    %c16 = arith.constant 16 : index
    %c0_5 = arith.constant 0 : index
    %11 = vector.load %arg5[%c16, %c0_5] : memref<776x128xf32, #tpu.memory_space<vmem>>, vector<4x9xf32>
    %cst_6 = arith.constant dense<0.000000e+00> : vector<2x9xf32>
    %12 = tpu.matmul %8, %11, %cst_6 {dimension_numbers = #tpu.dot_dimension_numbers<[1], [0], [0], [1], [0, 0, 1, 1], [], []>} : vector<2x4xf32>, vector<4x9xf32>, vector<2x9xf32> -> vector<2x9xf32>
    %13 = arith.addf %10, %12 : vector<2x9xf32>
    %c24 = arith.constant 24 : index
    %c0_7 = arith.constant 0 : index
    %14 = vector.load %arg5[%c24, %c0_7] : memref<776x128xf32, #tpu.memory_space<vmem>>, vector<1x9xf32>
    %15 = vector.broadcast %14 : vector<1x9xf32> to vector<2x9xf32>
    %16 = arith.addf %13, %15 : vector<2x9xf32>
    %cst_8 = arith.constant 0.000000e+00 : f32
    %17 = vector.broadcast %cst_8 : f32 to vector<2x9xf32>
    %18 = arith.subf %17, %16 : vector<2x9xf32>
    %19 = math.exp %18 : vector<2x9xf32>
    %cst_9 = arith.constant 1.000000e+00 : f32
    %20 = vector.broadcast %cst_9 : f32 to vector<2x9xf32>
    %21 = arith.addf %20, %19 : vector<2x9xf32>
    %cst_10 = arith.constant 1.000000e+00 : f32
    %22 = vector.broadcast %cst_10 : f32 to vector<2x9xf32>
    %23 = arith.divf %22, %21 : vector<2x9xf32>
    %24 = arith.mulf %16, %23 : vector<2x9xf32>
    %25 = vector.extract_strided_slice %24 {offsets = [0, 0], sizes = [2, 8], strides = [1, 1]} : vector<2x9xf32> to vector<2x8xf32>
    %26 = vector.extract_strided_slice %24 {offsets = [0, 8], sizes = [2, 1], strides = [1, 1]} : vector<2x9xf32> to vector<2x1xf32>
    %c32 = arith.constant 32 : index
    %c0_11 = arith.constant 0 : index
    %27 = vector.load %arg5[%c32, %c0_11] : memref<776x128xf32, #tpu.memory_space<vmem>>, vector<8x80xf32>
    %cst_12 = arith.constant dense<0.000000e+00> : vector<2x80xf32>
    %28 = tpu.matmul %25, %27, %cst_12 {dimension_numbers = #tpu.dot_dimension_numbers<[1], [0], [0], [1], [0, 0, 1, 1], [], []>} : vector<2x8xf32>, vector<8x80xf32>, vector<2x80xf32> -> vector<2x80xf32>
    %29 = vector.extract_strided_slice %28 {offsets = [0, 0], sizes = [2, 16], strides = [1, 1]} : vector<2x80xf32> to vector<2x16xf32>
    %c56 = arith.constant 56 : index
    %c0_13 = arith.constant 0 : index
    %30 = vector.load %arg5[%c56, %c0_13] : memref<776x128xf32, #tpu.memory_space<vmem>>, vector<1x16xf32>
    %31 = vector.broadcast %30 : vector<1x16xf32> to vector<2x16xf32>
    %32 = arith.addf %29, %31 : vector<2x16xf32>
    %33 = vector.extract_strided_slice %28 {offsets = [0, 16], sizes = [2, 32], strides = [1, 1]} : vector<2x80xf32> to vector<2x32xf32>
    %c80 = arith.constant 80 : index
    %c0_14 = arith.constant 0 : index
    %34 = vector.load %arg5[%c80, %c0_14] : memref<776x128xf32, #tpu.memory_space<vmem>>, vector<1x32xf32>
    %35 = vector.broadcast %34 : vector<1x32xf32> to vector<2x32xf32>
    %36 = arith.addf %33, %35 : vector<2x32xf32>
    %37 = vector.extract_strided_slice %28 {offsets = [0, 48], sizes = [2, 32], strides = [1, 1]} : vector<2x80xf32> to vector<2x32xf32>
    %c120 = arith.constant 120 : index
    %c0_15 = arith.constant 0 : index
    %38 = vector.load %arg5[%c120, %c0_15] : memref<776x128xf32, #tpu.memory_space<vmem>>, vector<1x32xf32>
    %39 = vector.broadcast %38 : vector<1x32xf32> to vector<2x32xf32>
    %40 = arith.addf %37, %39 : vector<2x32xf32>
    %c0_16 = arith.constant 0 : index
    %c0_17 = arith.constant 0 : index
    %41 = vector.load %arg1[%c0_16, %c0_17] : memref<16x12xf32, #tpu.memory_space<vmem>>, vector<16x12xf32>
    %c40 = arith.constant 40 : index
    %c0_18 = arith.constant 0 : index
    %42 = vector.load %arg5[%c40, %c0_18] : memref<776x128xf32, #tpu.memory_space<vmem>>, vector<12x16xf32>
    %cst_19 = arith.constant dense<0.000000e+00> : vector<16x16xf32>
    %43 = tpu.matmul %41, %42, %cst_19 {dimension_numbers = #tpu.dot_dimension_numbers<[1], [0], [0], [1], [0, 0, 1, 1], [], []>} : vector<16x12xf32>, vector<12x16xf32>, vector<16x16xf32> -> vector<16x16xf32>
    %44 = vector.shape_cast %43 : vector<16x16xf32> to vector<2x8x16xf32>
    %45 = vector.shape_cast %32 : vector<2x16xf32> to vector<2x1x16xf32>
    %46 = vector.broadcast %45 : vector<2x1x16xf32> to vector<2x8x16xf32>
    %47 = arith.addf %44, %46 : vector<2x8x16xf32>
    %48 = vector.shape_cast %47 : vector<2x8x16xf32> to vector<16x16xf32>
    %cst_20 = arith.constant 0.000000e+00 : f32
    %49 = vector.broadcast %cst_20 : f32 to vector<16x16xf32>
    %50 = arith.subf %49, %48 : vector<16x16xf32>
    %51 = math.exp %50 : vector<16x16xf32>
    %cst_21 = arith.constant 1.000000e+00 : f32
    %52 = vector.broadcast %cst_21 : f32 to vector<16x16xf32>
    %53 = arith.addf %52, %51 : vector<16x16xf32>
    %cst_22 = arith.constant 1.000000e+00 : f32
    %54 = vector.broadcast %cst_22 : f32 to vector<16x16xf32>
    %55 = arith.divf %54, %53 : vector<16x16xf32>
    %56 = arith.mulf %48, %55 : vector<16x16xf32>
    %c0_23 = arith.constant 0 : index
    %c0_24 = arith.constant 0 : index
    %57 = vector.load %arg2[%c0_23, %c0_24] : memref<16x6xf32, #tpu.memory_space<vmem>>, vector<16x6xf32>
    %58 = vector.shape_cast %57 : vector<16x6xf32> to vector<2x8x6xf32>
    %59 = vector.shape_cast %26 : vector<2x1xf32> to vector<2x1x1xf32>
    %60 = vector.broadcast %59 : vector<2x1x1xf32> to vector<2x8x6xf32>
    %61 = arith.mulf %58, %60 : vector<2x8x6xf32>
    %62 = vector.shape_cast %61 : vector<2x8x6xf32> to vector<16x6xf32>
    %c600 = arith.constant 600 : index
    %c0_25 = arith.constant 0 : index
    %63 = vector.load %arg5[%c600, %c0_25] : memref<776x128xf32, #tpu.memory_space<vmem>>, vector<6x12xf32>
    %cst_26 = arith.constant dense<0.000000e+00> : vector<16x12xf32>
    %64 = tpu.matmul %62, %63, %cst_26 {dimension_numbers = #tpu.dot_dimension_numbers<[1], [0], [0], [1], [0, 0, 1, 1], [], []>} : vector<16x6xf32>, vector<6x12xf32>, vector<16x12xf32> -> vector<16x12xf32>
    %c0_27 = arith.constant 0 : index
    %c0_28 = arith.constant 0 : index
    %65 = vector.load %arg3[%c0_27, %c0_28] : memref<16x16xf32, #tpu.memory_space<vmem>>, vector<16x16xf32>
    %c64 = arith.constant 64 : index
    %c0_29 = arith.constant 0 : index
    %66 = vector.load %arg5[%c64, %c0_29] : memref<776x128xf32, #tpu.memory_space<vmem>>, vector<16x32xf32>
    %cst_30 = arith.constant dense<0.000000e+00> : vector<16x32xf32>
    %67 = tpu.matmul %65, %66, %cst_30 {dimension_numbers = #tpu.dot_dimension_numbers<[1], [0], [0], [1], [0, 0, 1, 1], [], []>} : vector<16x16xf32>, vector<16x32xf32>, vector<16x32xf32> -> vector<16x32xf32>
    %68 = vector.shape_cast %67 : vector<16x32xf32> to vector<2x8x32xf32>
    %69 = vector.shape_cast %36 : vector<2x32xf32> to vector<2x1x32xf32>
    %70 = vector.broadcast %69 : vector<2x1x32xf32> to vector<2x8x32xf32>
    %71 = arith.addf %68, %70 : vector<2x8x32xf32>
    %72 = vector.shape_cast %71 : vector<2x8x32xf32> to vector<16x32xf32>
    %cst_31 = arith.constant 0.000000e+00 : f32
    %73 = vector.broadcast %cst_31 : f32 to vector<16x32xf32>
    %74 = arith.subf %73, %72 : vector<16x32xf32>
    %75 = math.exp %74 : vector<16x32xf32>
    %cst_32 = arith.constant 1.000000e+00 : f32
    %76 = vector.broadcast %cst_32 : f32 to vector<16x32xf32>
    %77 = arith.addf %76, %75 : vector<16x32xf32>
    %cst_33 = arith.constant 1.000000e+00 : f32
    %78 = vector.broadcast %cst_33 : f32 to vector<16x32xf32>
    %79 = arith.divf %78, %77 : vector<16x32xf32>
    %80 = arith.mulf %72, %79 : vector<16x32xf32>
    %c0_34 = arith.constant 0 : index
    %c0_35 = arith.constant 0 : index
    %81 = vector.load %arg4[%c0_34, %c0_35] : memref<16x12xf32, #tpu.memory_space<vmem>>, vector<16x12xf32>
    %82 = vector.shape_cast %81 : vector<16x12xf32> to vector<2x8x12xf32>
    %83 = vector.shape_cast %26 : vector<2x1xf32> to vector<2x1x1xf32>
    %84 = vector.broadcast %83 : vector<2x1x1xf32> to vector<2x8x12xf32>
    %85 = arith.mulf %82, %84 : vector<2x8x12xf32>
    %86 = vector.shape_cast %85 : vector<2x8x12xf32> to vector<16x12xf32>
    %c608 = arith.constant 608 : index
    %c0_36 = arith.constant 0 : index
    %87 = vector.load %arg5[%c608, %c0_36] : memref<776x128xf32, #tpu.memory_space<vmem>>, vector<12x24xf32>
    %cst_37 = arith.constant dense<0.000000e+00> : vector<16x24xf32>
    %88 = tpu.matmul %86, %87, %cst_37 {dimension_numbers = #tpu.dot_dimension_numbers<[1], [0], [0], [1], [0, 0, 1, 1], [], []>} : vector<16x12xf32>, vector<12x24xf32>, vector<16x24xf32> -> vector<16x24xf32>
    %c88 = arith.constant 88 : index
    %c0_38 = arith.constant 0 : index
    %89 = vector.load %arg5[%c88, %c0_38] : memref<776x128xf32, #tpu.memory_space<vmem>>, vector<32x32xf32>
    %cst_39 = arith.constant dense<0.000000e+00> : vector<16x32xf32>
    %90 = tpu.matmul %80, %89, %cst_39 {dimension_numbers = #tpu.dot_dimension_numbers<[1], [0], [0], [1], [0, 0, 1, 1], [], []>} : vector<16x32xf32>, vector<32x32xf32>, vector<16x32xf32> -> vector<16x32xf32>
    %91 = vector.shape_cast %90 : vector<16x32xf32> to vector<2x8x32xf32>
    %92 = vector.shape_cast %40 : vector<2x32xf32> to vector<2x1x32xf32>
    %93 = vector.broadcast %92 : vector<2x1x32xf32> to vector<2x8x32xf32>
    %94 = arith.addf %91, %93 : vector<2x8x32xf32>
    %95 = vector.shape_cast %94 : vector<2x8x32xf32> to vector<16x32xf32>
    %cst_40 = arith.constant 0.000000e+00 : f32
    %96 = vector.broadcast %cst_40 : f32 to vector<16x32xf32>
    %97 = arith.subf %96, %95 : vector<16x32xf32>
    %98 = math.exp %97 : vector<16x32xf32>
    %cst_41 = arith.constant 1.000000e+00 : f32
    %99 = vector.broadcast %cst_41 : f32 to vector<16x32xf32>
    %100 = arith.addf %99, %98 : vector<16x32xf32>
    %cst_42 = arith.constant 1.000000e+00 : f32
    %101 = vector.broadcast %cst_42 : f32 to vector<16x32xf32>
    %102 = arith.divf %101, %100 : vector<16x32xf32>
    %103 = arith.mulf %95, %102 : vector<16x32xf32>
    %104 = vector.shape_cast %88 : vector<16x24xf32> to vector<2x8x24xf32>
    %105 = vector.shape_cast %26 : vector<2x1xf32> to vector<2x1x1xf32>
    %106 = vector.broadcast %105 : vector<2x1x1xf32> to vector<2x8x24xf32>
    %107 = arith.mulf %104, %106 : vector<2x8x24xf32>
    %108 = vector.shape_cast %107 : vector<2x8x24xf32> to vector<16x24xf32>
    %c624 = arith.constant 624 : index
    %c0_43 = arith.constant 0 : index
    %109 = vector.load %arg5[%c624, %c0_43] : memref<776x128xf32, #tpu.memory_space<vmem>>, vector<24x24xf32>
    %cst_44 = arith.constant dense<0.000000e+00> : vector<16x24xf32>
    %110 = tpu.matmul %108, %109, %cst_44 {dimension_numbers = #tpu.dot_dimension_numbers<[1], [0], [0], [1], [0, 0, 1, 1], [], []>} : vector<16x24xf32>, vector<24x24xf32>, vector<16x24xf32> -> vector<16x24xf32>
    %cst_45 = arith.constant dense<0.000000e+00> : vector<16xf32>
    %111 = vector.multi_reduction <add>, %103, %cst_45 [1] : vector<16x32xf32> to vector<16xf32>
    %112 = vector.shape_cast %111 : vector<16xf32> to vector<16x1xf32>
    %113 = vector.shape_cast %112 : vector<16x1xf32> to vector<2x8x1xf32>
    %114 = tpu.iota {dimensions = array<i32: 1>} : vector<2x8x1xi32>
    %115 = arith.sitofp %114 : vector<2x8x1xi32> to vector<2x8x1xf32>
    %cst_46 = arith.constant 0.000000e+00 : f32
    %116 = vector.broadcast %cst_46 : f32 to vector<2x8x1xf32>
    %cst_47 = arith.constant dense<0xFF800000> : vector<2x1xf32>
    %117 = vector.multi_reduction <maximumf>, %113, %cst_47 [1] : vector<2x8x1xf32> to vector<2x1xf32>
    %118 = vector.shape_cast %117 : vector<2x1xf32> to vector<2x1x1xf32>
    %119 = vector.broadcast %118 : vector<2x1x1xf32> to vector<2x8x1xf32>
    %120 = arith.cmpf oeq, %113, %119 : vector<2x8x1xf32>
    %cst_48 = arith.constant 8.000000e+00 : f32
    %121 = vector.broadcast %cst_48 : f32 to vector<2x8x1xf32>
    %122 = arith.select %120, %115, %121 : vector<2x8x1xi1>, vector<2x8x1xf32>
    %cst_49 = arith.constant dense<0x7F800000> : vector<2x1xf32>
    %123 = vector.multi_reduction <minimumf>, %122, %cst_49 [1] : vector<2x8x1xf32> to vector<2x1xf32>
    %124 = vector.shape_cast %123 : vector<2x1xf32> to vector<2x1x1xf32>
    %125 = vector.broadcast %124 : vector<2x1x1xf32> to vector<2x8x1xf32>
    %126 = arith.cmpf oeq, %115, %125 : vector<2x8x1xf32>
    %cst_50 = arith.constant 1.000000e+00 : f32
    %cst_51 = arith.constant 0.000000e+00 : f32
    %127 = vector.broadcast %cst_50 : f32 to vector<2x8x1xf32>
    %128 = vector.broadcast %cst_51 : f32 to vector<2x8x1xf32>
    %129 = arith.select %126, %127, %128 : vector<2x8x1xi1>, vector<2x8x1xf32>
    %130 = arith.maximumf %116, %129 : vector<2x8x1xf32>
    %cst_52 = arith.constant 0.000000e+00 : f32
    %131 = vector.broadcast %cst_52 : f32 to vector<2x8x1xf32>
    %132 = arith.cmpf ogt, %129, %131 : vector<2x8x1xf32>
    %cst_53 = arith.constant 0xFF800000 : f32
    %133 = vector.broadcast %cst_53 : f32 to vector<2x8x1xf32>
    %134 = arith.select %132, %133, %113 : vector<2x8x1xi1>, vector<2x8x1xf32>
    %cst_54 = arith.constant dense<0xFF800000> : vector<2x1xf32>
    %135 = vector.multi_reduction <maximumf>, %134, %cst_54 [1] : vector<2x8x1xf32> to vector<2x1xf32>
    %136 = vector.shape_cast %135 : vector<2x1xf32> to vector<2x1x1xf32>
    %137 = vector.broadcast %136 : vector<2x1x1xf32> to vector<2x8x1xf32>
    %138 = arith.cmpf oeq, %134, %137 : vector<2x8x1xf32>
    %cst_55 = arith.constant 8.000000e+00 : f32
    %139 = vector.broadcast %cst_55 : f32 to vector<2x8x1xf32>
    %140 = arith.select %138, %115, %139 : vector<2x8x1xi1>, vector<2x8x1xf32>
    %cst_56 = arith.constant dense<0x7F800000> : vector<2x1xf32>
    %141 = vector.multi_reduction <minimumf>, %140, %cst_56 [1] : vector<2x8x1xf32> to vector<2x1xf32>
    %142 = vector.shape_cast %141 : vector<2x1xf32> to vector<2x1x1xf32>
    %143 = vector.broadcast %142 : vector<2x1x1xf32> to vector<2x8x1xf32>
    %144 = arith.cmpf oeq, %115, %143 : vector<2x8x1xf32>
    %cst_57 = arith.constant 1.000000e+00 : f32
    %cst_58 = arith.constant 0.000000e+00 : f32
    %145 = vector.broadcast %cst_57 : f32 to vector<2x8x1xf32>
    %146 = vector.broadcast %cst_58 : f32 to vector<2x8x1xf32>
    %147 = arith.select %144, %145, %146 : vector<2x8x1xi1>, vector<2x8x1xf32>
    %148 = arith.maximumf %130, %147 : vector<2x8x1xf32>
    %cst_59 = arith.constant 0.000000e+00 : f32
    %149 = vector.broadcast %cst_59 : f32 to vector<2x8x1xf32>
    %150 = arith.cmpf ogt, %147, %149 : vector<2x8x1xf32>
    %cst_60 = arith.constant 0xFF800000 : f32
    %151 = vector.broadcast %cst_60 : f32 to vector<2x8x1xf32>
    %152 = arith.select %150, %151, %134 : vector<2x8x1xi1>, vector<2x8x1xf32>
    %cst_61 = arith.constant dense<0xFF800000> : vector<2x1xf32>
    %153 = vector.multi_reduction <maximumf>, %152, %cst_61 [1] : vector<2x8x1xf32> to vector<2x1xf32>
    %154 = vector.shape_cast %153 : vector<2x1xf32> to vector<2x1x1xf32>
    %155 = vector.broadcast %154 : vector<2x1x1xf32> to vector<2x8x1xf32>
    %156 = arith.cmpf oeq, %152, %155 : vector<2x8x1xf32>
    %cst_62 = arith.constant 8.000000e+00 : f32
    %157 = vector.broadcast %cst_62 : f32 to vector<2x8x1xf32>
    %158 = arith.select %156, %115, %157 : vector<2x8x1xi1>, vector<2x8x1xf32>
    %cst_63 = arith.constant dense<0x7F800000> : vector<2x1xf32>
    %159 = vector.multi_reduction <minimumf>, %158, %cst_63 [1] : vector<2x8x1xf32> to vector<2x1xf32>
    %160 = vector.shape_cast %159 : vector<2x1xf32> to vector<2x1x1xf32>
    %161 = vector.broadcast %160 : vector<2x1x1xf32> to vector<2x8x1xf32>
    %162 = arith.cmpf oeq, %115, %161 : vector<2x8x1xf32>
    %cst_64 = arith.constant 1.000000e+00 : f32
    %cst_65 = arith.constant 0.000000e+00 : f32
    %163 = vector.broadcast %cst_64 : f32 to vector<2x8x1xf32>
    %164 = vector.broadcast %cst_65 : f32 to vector<2x8x1xf32>
    %165 = arith.select %162, %163, %164 : vector<2x8x1xi1>, vector<2x8x1xf32>
    %166 = arith.maximumf %148, %165 : vector<2x8x1xf32>
    %cst_66 = arith.constant 0.000000e+00 : f32
    %167 = vector.broadcast %cst_66 : f32 to vector<2x8x1xf32>
    %168 = arith.cmpf ogt, %165, %167 : vector<2x8x1xf32>
    %cst_67 = arith.constant 0xFF800000 : f32
    %169 = vector.broadcast %cst_67 : f32 to vector<2x8x1xf32>
    %170 = arith.select %168, %169, %152 : vector<2x8x1xi1>, vector<2x8x1xf32>
    %cst_68 = arith.constant dense<0xFF800000> : vector<2x1xf32>
    %171 = vector.multi_reduction <maximumf>, %170, %cst_68 [1] : vector<2x8x1xf32> to vector<2x1xf32>
    %172 = vector.shape_cast %171 : vector<2x1xf32> to vector<2x1x1xf32>
    %173 = vector.broadcast %172 : vector<2x1x1xf32> to vector<2x8x1xf32>
    %174 = arith.cmpf oeq, %170, %173 : vector<2x8x1xf32>
    %cst_69 = arith.constant 8.000000e+00 : f32
    %175 = vector.broadcast %cst_69 : f32 to vector<2x8x1xf32>
    %176 = arith.select %174, %115, %175 : vector<2x8x1xi1>, vector<2x8x1xf32>
    %cst_70 = arith.constant dense<0x7F800000> : vector<2x1xf32>
    %177 = vector.multi_reduction <minimumf>, %176, %cst_70 [1] : vector<2x8x1xf32> to vector<2x1xf32>
    %178 = vector.shape_cast %177 : vector<2x1xf32> to vector<2x1x1xf32>
    %179 = vector.broadcast %178 : vector<2x1x1xf32> to vector<2x8x1xf32>
    %180 = arith.cmpf oeq, %115, %179 : vector<2x8x1xf32>
    %cst_71 = arith.constant 1.000000e+00 : f32
    %cst_72 = arith.constant 0.000000e+00 : f32
    %181 = vector.broadcast %cst_71 : f32 to vector<2x8x1xf32>
    %182 = vector.broadcast %cst_72 : f32 to vector<2x8x1xf32>
    %183 = arith.select %180, %181, %182 : vector<2x8x1xi1>, vector<2x8x1xf32>
    %184 = arith.maximumf %166, %183 : vector<2x8x1xf32>
    %185 = vector.shape_cast %184 : vector<2x8x1xf32> to vector<16x1xf32>
    %c128 = arith.constant 128 : index
    %c0_73 = arith.constant 0 : index
    %186 = vector.load %arg5[%c128, %c0_73] : memref<776x128xf32, #tpu.memory_space<vmem>>, vector<32x64xf32>
    %cst_74 = arith.constant dense<0.000000e+00> : vector<16x64xf32>
    %187 = tpu.matmul %103, %186, %cst_74 {dimension_numbers = #tpu.dot_dimension_numbers<[1], [0], [0], [1], [0, 0, 1, 1], [], []>} : vector<16x32xf32>, vector<32x64xf32>, vector<16x64xf32> -> vector<16x64xf32>
    %c160 = arith.constant 160 : index
    %c0_75 = arith.constant 0 : index
    %188 = vector.load %arg5[%c160, %c0_75] : memref<776x128xf32, #tpu.memory_space<vmem>>, vector<1x64xf32>
    %189 = vector.broadcast %188 : vector<1x64xf32> to vector<16x64xf32>
    %190 = arith.addf %187, %189 : vector<16x64xf32>
    %cst_76 = arith.constant 0.000000e+00 : f32
    %191 = vector.broadcast %cst_76 : f32 to vector<16x64xf32>
    %192 = arith.subf %191, %190 : vector<16x64xf32>
    %193 = math.exp %192 : vector<16x64xf32>
    %cst_77 = arith.constant 1.000000e+00 : f32
    %194 = vector.broadcast %cst_77 : f32 to vector<16x64xf32>
    %195 = arith.addf %194, %193 : vector<16x64xf32>
    %cst_78 = arith.constant 1.000000e+00 : f32
    %196 = vector.broadcast %cst_78 : f32 to vector<16x64xf32>
    %197 = arith.divf %196, %195 : vector<16x64xf32>
    %198 = arith.mulf %190, %197 : vector<16x64xf32>
    %c168 = arith.constant 168 : index
    %c0_79 = arith.constant 0 : index
    %199 = vector.load %arg5[%c168, %c0_79] : memref<776x128xf32, #tpu.memory_space<vmem>>, vector<64x64xf32>
    %cst_80 = arith.constant dense<0.000000e+00> : vector<16x64xf32>
    %200 = tpu.matmul %198, %199, %cst_80 {dimension_numbers = #tpu.dot_dimension_numbers<[1], [0], [0], [1], [0, 0, 1, 1], [], []>} : vector<16x64xf32>, vector<64x64xf32>, vector<16x64xf32> -> vector<16x64xf32>
    %c232 = arith.constant 232 : index
    %c0_81 = arith.constant 0 : index
    %201 = vector.load %arg5[%c232, %c0_81] : memref<776x128xf32, #tpu.memory_space<vmem>>, vector<1x64xf32>
    %202 = vector.broadcast %201 : vector<1x64xf32> to vector<16x64xf32>
    %203 = arith.addf %200, %202 : vector<16x64xf32>
    %cst_82 = arith.constant 0.000000e+00 : f32
    %204 = vector.broadcast %cst_82 : f32 to vector<16x64xf32>
    %205 = arith.subf %204, %203 : vector<16x64xf32>
    %206 = math.exp %205 : vector<16x64xf32>
    %cst_83 = arith.constant 1.000000e+00 : f32
    %207 = vector.broadcast %cst_83 : f32 to vector<16x64xf32>
    %208 = arith.addf %207, %206 : vector<16x64xf32>
    %cst_84 = arith.constant 1.000000e+00 : f32
    %209 = vector.broadcast %cst_84 : f32 to vector<16x64xf32>
    %210 = arith.divf %209, %208 : vector<16x64xf32>
    %211 = arith.mulf %203, %210 : vector<16x64xf32>
    %c240 = arith.constant 240 : index
    %c0_85 = arith.constant 0 : index
    %212 = vector.load %arg5[%c240, %c0_85] : memref<776x128xf32, #tpu.memory_space<vmem>>, vector<64x64xf32>
    %cst_86 = arith.constant dense<0.000000e+00> : vector<16x64xf32>
    %213 = tpu.matmul %211, %212, %cst_86 {dimension_numbers = #tpu.dot_dimension_numbers<[1], [0], [0], [1], [0, 0, 1, 1], [], []>} : vector<16x64xf32>, vector<64x64xf32>, vector<16x64xf32> -> vector<16x64xf32>
    %c304 = arith.constant 304 : index
    %c0_87 = arith.constant 0 : index
    %214 = vector.load %arg5[%c304, %c0_87] : memref<776x128xf32, #tpu.memory_space<vmem>>, vector<1x64xf32>
    %215 = vector.broadcast %214 : vector<1x64xf32> to vector<16x64xf32>
    %216 = arith.addf %213, %215 : vector<16x64xf32>
    %cst_88 = arith.constant 0.000000e+00 : f32
    %217 = vector.broadcast %cst_88 : f32 to vector<16x64xf32>
    %218 = arith.subf %217, %216 : vector<16x64xf32>
    %219 = math.exp %218 : vector<16x64xf32>
    %cst_89 = arith.constant 1.000000e+00 : f32
    %220 = vector.broadcast %cst_89 : f32 to vector<16x64xf32>
    %221 = arith.addf %220, %219 : vector<16x64xf32>
    %cst_90 = arith.constant 1.000000e+00 : f32
    %222 = vector.broadcast %cst_90 : f32 to vector<16x64xf32>
    %223 = arith.divf %222, %221 : vector<16x64xf32>
    %224 = arith.mulf %216, %223 : vector<16x64xf32>
    %225 = vector.broadcast %185 : vector<16x1xf32> to vector<16x64xf32>
    %226 = arith.mulf %225, %224 : vector<16x64xf32>
    %227 = vector.shape_cast %226 : vector<16x64xf32> to vector<2x8x64xf32>
    %cst_91 = arith.constant dense<0.000000e+00> : vector<2x64xf32>
    %228 = vector.multi_reduction <add>, %227, %cst_91 [1] : vector<2x8x64xf32> to vector<2x64xf32>
    %cst_92 = arith.constant 2.500000e-01 : f32
    %229 = vector.broadcast %cst_92 : f32 to vector<2x64xf32>
    %230 = arith.mulf %228, %229 : vector<2x64xf32>
    %c312 = arith.constant 312 : index
    %c0_93 = arith.constant 0 : index
    %231 = vector.load %arg5[%c312, %c0_93] : memref<776x128xf32, #tpu.memory_space<vmem>>, vector<64x64xf32>
    %cst_94 = arith.constant dense<0.000000e+00> : vector<2x64xf32>
    %232 = tpu.matmul %230, %231, %cst_94 {dimension_numbers = #tpu.dot_dimension_numbers<[1], [0], [0], [1], [0, 0, 1, 1], [], []>} : vector<2x64xf32>, vector<64x64xf32>, vector<2x64xf32> -> vector<2x64xf32>
    %c376 = arith.constant 376 : index
    %c0_95 = arith.constant 0 : index
    %233 = vector.load %arg5[%c376, %c0_95] : memref<776x128xf32, #tpu.memory_space<vmem>>, vector<1x64xf32>
    %234 = vector.broadcast %233 : vector<1x64xf32> to vector<2x64xf32>
    %235 = arith.addf %232, %234 : vector<2x64xf32>
    %cst_96 = arith.constant 0.000000e+00 : f32
    %236 = vector.broadcast %cst_96 : f32 to vector<2x64xf32>
    %237 = arith.subf %236, %235 : vector<2x64xf32>
    %238 = math.exp %237 : vector<2x64xf32>
    %cst_97 = arith.constant 1.000000e+00 : f32
    %239 = vector.broadcast %cst_97 : f32 to vector<2x64xf32>
    %240 = arith.addf %239, %238 : vector<2x64xf32>
    %cst_98 = arith.constant 1.000000e+00 : f32
    %241 = vector.broadcast %cst_98 : f32 to vector<2x64xf32>
    %242 = arith.divf %241, %240 : vector<2x64xf32>
    %243 = arith.mulf %235, %242 : vector<2x64xf32>
    %244 = vector.shape_cast %211 : vector<16x64xf32> to vector<2x8x64xf32>
    %245 = vector.shape_cast %243 : vector<2x64xf32> to vector<2x1x64xf32>
    %246 = vector.broadcast %245 : vector<2x1x64xf32> to vector<2x8x64xf32>
    %247 = arith.addf %244, %246 : vector<2x8x64xf32>
    %248 = vector.shape_cast %247 : vector<2x8x64xf32> to vector<16x64xf32>
    %c384 = arith.constant 384 : index
    %c0_99 = arith.constant 0 : index
    %249 = vector.load %arg5[%c384, %c0_99] : memref<776x128xf32, #tpu.memory_space<vmem>>, vector<64x64xf32>
    %cst_100 = arith.constant dense<0.000000e+00> : vector<16x64xf32>
    %250 = tpu.matmul %248, %249, %cst_100 {dimension_numbers = #tpu.dot_dimension_numbers<[1], [0], [0], [1], [0, 0, 1, 1], [], []>} : vector<16x64xf32>, vector<64x64xf32>, vector<16x64xf32> -> vector<16x64xf32>
    %c448 = arith.constant 448 : index
    %c0_101 = arith.constant 0 : index
    %251 = vector.load %arg5[%c448, %c0_101] : memref<776x128xf32, #tpu.memory_space<vmem>>, vector<1x64xf32>
    %252 = vector.broadcast %251 : vector<1x64xf32> to vector<16x64xf32>
    %253 = arith.addf %250, %252 : vector<16x64xf32>
    %cst_102 = arith.constant 0.000000e+00 : f32
    %254 = vector.broadcast %cst_102 : f32 to vector<16x64xf32>
    %255 = arith.subf %254, %253 : vector<16x64xf32>
    %256 = math.exp %255 : vector<16x64xf32>
    %cst_103 = arith.constant 1.000000e+00 : f32
    %257 = vector.broadcast %cst_103 : f32 to vector<16x64xf32>
    %258 = arith.addf %257, %256 : vector<16x64xf32>
    %cst_104 = arith.constant 1.000000e+00 : f32
    %259 = vector.broadcast %cst_104 : f32 to vector<16x64xf32>
    %260 = arith.divf %259, %258 : vector<16x64xf32>
    %261 = arith.mulf %253, %260 : vector<16x64xf32>
    %262 = vector.broadcast %185 : vector<16x1xf32> to vector<16x64xf32>
    %263 = arith.mulf %262, %261 : vector<16x64xf32>
    %c456 = arith.constant 456 : index
    %c0_105 = arith.constant 0 : index
    %264 = vector.load %arg5[%c456, %c0_105] : memref<776x128xf32, #tpu.memory_space<vmem>>, vector<64x32xf32>
    %cst_106 = arith.constant dense<0.000000e+00> : vector<16x32xf32>
    %265 = tpu.matmul %263, %264, %cst_106 {dimension_numbers = #tpu.dot_dimension_numbers<[1], [0], [0], [1], [0, 0, 1, 1], [], []>} : vector<16x64xf32>, vector<64x32xf32>, vector<16x32xf32> -> vector<16x32xf32>
    %c520 = arith.constant 520 : index
    %c0_107 = arith.constant 0 : index
    %266 = vector.load %arg5[%c520, %c0_107] : memref<776x128xf32, #tpu.memory_space<vmem>>, vector<32x32xf32>
    %cst_108 = arith.constant dense<0.000000e+00> : vector<16x32xf32>
    %267 = tpu.matmul %103, %266, %cst_108 {dimension_numbers = #tpu.dot_dimension_numbers<[1], [0], [0], [1], [0, 0, 1, 1], [], []>} : vector<16x32xf32>, vector<32x32xf32>, vector<16x32xf32> -> vector<16x32xf32>
    %268 = arith.addf %265, %267 : vector<16x32xf32>
    %c552 = arith.constant 552 : index
    %c0_109 = arith.constant 0 : index
    %269 = vector.load %arg5[%c552, %c0_109] : memref<776x128xf32, #tpu.memory_space<vmem>>, vector<1x32xf32>
    %270 = vector.broadcast %269 : vector<1x32xf32> to vector<16x32xf32>
    %271 = arith.addf %268, %270 : vector<16x32xf32>
    %cst_110 = arith.constant 0.000000e+00 : f32
    %272 = vector.broadcast %cst_110 : f32 to vector<16x32xf32>
    %273 = arith.subf %272, %271 : vector<16x32xf32>
    %274 = math.exp %273 : vector<16x32xf32>
    %cst_111 = arith.constant 1.000000e+00 : f32
    %275 = vector.broadcast %cst_111 : f32 to vector<16x32xf32>
    %276 = arith.addf %275, %274 : vector<16x32xf32>
    %cst_112 = arith.constant 1.000000e+00 : f32
    %277 = vector.broadcast %cst_112 : f32 to vector<16x32xf32>
    %278 = arith.divf %277, %276 : vector<16x32xf32>
    %279 = arith.mulf %271, %278 : vector<16x32xf32>
    %c648 = arith.constant 648 : index
    %c0_113 = arith.constant 0 : index
    %280 = vector.load %arg5[%c648, %c0_113] : memref<776x128xf32, #tpu.memory_space<vmem>>, vector<64x24xf32>
    %cst_114 = arith.constant dense<0.000000e+00> : vector<16x24xf32>
    %281 = tpu.matmul %198, %280, %cst_114 {dimension_numbers = #tpu.dot_dimension_numbers<[1], [0], [0], [1], [0, 0, 1, 1], [], []>} : vector<16x64xf32>, vector<64x24xf32>, vector<16x24xf32> -> vector<16x24xf32>
    %282 = vector.broadcast %185 : vector<16x1xf32> to vector<16x24xf32>
    %283 = arith.mulf %282, %281 : vector<16x24xf32>
    %c712 = arith.constant 712 : index
    %c0_115 = arith.constant 0 : index
    %284 = vector.load %arg5[%c712, %c0_115] : memref<776x128xf32, #tpu.memory_space<vmem>>, vector<24x24xf32>
    %cst_116 = arith.constant dense<0.000000e+00> : vector<16x24xf32>
    %285 = tpu.matmul %110, %284, %cst_116 {dimension_numbers = #tpu.dot_dimension_numbers<[1], [0], [0], [1], [0, 0, 1, 1], [], []>} : vector<16x24xf32>, vector<24x24xf32>, vector<16x24xf32> -> vector<16x24xf32>
    %286 = arith.addf %283, %285 : vector<16x24xf32>
    %287 = arith.addf %279, %80 : vector<16x32xf32>
    %288 = arith.addf %286, %88 : vector<16x24xf32>
    %c560 = arith.constant 560 : index
    %c0_117 = arith.constant 0 : index
    %289 = vector.load %arg5[%c560, %c0_117] : memref<776x128xf32, #tpu.memory_space<vmem>>, vector<32x16xf32>
    %cst_118 = arith.constant dense<0.000000e+00> : vector<16x16xf32>
    %290 = tpu.matmul %287, %289, %cst_118 {dimension_numbers = #tpu.dot_dimension_numbers<[1], [0], [0], [1], [0, 0, 1, 1], [], []>} : vector<16x32xf32>, vector<32x16xf32>, vector<16x16xf32> -> vector<16x16xf32>
    %c592 = arith.constant 592 : index
    %c0_119 = arith.constant 0 : index
    %291 = vector.load %arg5[%c592, %c0_119] : memref<776x128xf32, #tpu.memory_space<vmem>>, vector<1x16xf32>
    %292 = vector.broadcast %291 : vector<1x16xf32> to vector<16x16xf32>
    %293 = arith.addf %290, %292 : vector<16x16xf32>
    %cst_120 = arith.constant 0.000000e+00 : f32
    %294 = vector.broadcast %cst_120 : f32 to vector<16x16xf32>
    %295 = arith.subf %294, %293 : vector<16x16xf32>
    %296 = math.exp %295 : vector<16x16xf32>
    %cst_121 = arith.constant 1.000000e+00 : f32
    %297 = vector.broadcast %cst_121 : f32 to vector<16x16xf32>
    %298 = arith.addf %297, %296 : vector<16x16xf32>
    %cst_122 = arith.constant 1.000000e+00 : f32
    %299 = vector.broadcast %cst_122 : f32 to vector<16x16xf32>
    %300 = arith.divf %299, %298 : vector<16x16xf32>
    %301 = arith.mulf %293, %300 : vector<16x16xf32>
    %c0_123 = arith.constant 0 : index
    %c0_124 = arith.constant 0 : index
    %302 = vector.load %arg8[%c0_123, %c0_124] : memref<16x16xf32, #tpu.memory_space<vmem>>, vector<16x16xf32>
    tpu.vector_store %arg8[%c0_123, %c0_124], %301 {strides = array<i32>} : memref<16x16xf32, #tpu.memory_space<vmem>>, vector<16x16xf32>,
    %c736 = arith.constant 736 : index
    %c0_125 = arith.constant 0 : index
    %303 = vector.load %arg5[%c736, %c0_125] : memref<776x128xf32, #tpu.memory_space<vmem>>, vector<24x12xf32>
    %cst_126 = arith.constant dense<0.000000e+00> : vector<16x12xf32>
    %304 = tpu.matmul %288, %303, %cst_126 {dimension_numbers = #tpu.dot_dimension_numbers<[1], [0], [0], [1], [0, 0, 1, 1], [], []>} : vector<16x24xf32>, vector<24x12xf32>, vector<16x12xf32> -> vector<16x12xf32>
    %c0_127 = arith.constant 0 : index
    %c0_128 = arith.constant 0 : index
    %305 = vector.load %arg9[%c0_127, %c0_128] : memref<16x12xf32, #tpu.memory_space<vmem>>, vector<16x12xf32>
    tpu.vector_store %arg9[%c0_127, %c0_128], %304 {strides = array<i32>} : memref<16x12xf32, #tpu.memory_space<vmem>>, vector<16x12xf32>,
    %c592_129 = arith.constant 592 : index
    %c0_130 = arith.constant 0 : index
    %306 = vector.load %arg5[%c592_129, %c0_130] : memref<776x128xf32, #tpu.memory_space<vmem>>, vector<1x16xf32>
    %cst_131 = arith.constant 0.000000e+00 : f32
    %307 = vector.broadcast %cst_131 : f32 to vector<1x16xf32>
    %308 = arith.subf %307, %306 : vector<1x16xf32>
    %309 = math.exp %308 : vector<1x16xf32>
    %cst_132 = arith.constant 1.000000e+00 : f32
    %310 = vector.broadcast %cst_132 : f32 to vector<1x16xf32>
    %311 = arith.addf %310, %309 : vector<1x16xf32>
    %cst_133 = arith.constant 1.000000e+00 : f32
    %312 = vector.broadcast %cst_133 : f32 to vector<1x16xf32>
    %313 = arith.divf %312, %311 : vector<1x16xf32>
    %314 = arith.mulf %306, %313 : vector<1x16xf32>
    %315 = vector.broadcast %314 : vector<1x16xf32> to vector<16x16xf32>
    %316 = arith.addf %56, %315 : vector<16x16xf32>
    %c0_134 = arith.constant 0 : index
    %c0_135 = arith.constant 0 : index
    %317 = vector.load %arg7[%c0_134, %c0_135] : memref<16x16xf32, #tpu.memory_space<vmem>>, vector<16x16xf32>
    tpu.vector_store %arg7[%c0_134, %c0_135], %316 {strides = array<i32>} : memref<16x16xf32, #tpu.memory_space<vmem>>, vector<16x16xf32>,
    %318 = vector.shape_cast %64 : vector<16x12xf32> to vector<2x8x12xf32>
    %319 = vector.shape_cast %26 : vector<2x1xf32> to vector<2x1x1xf32>
    %320 = vector.broadcast %319 : vector<2x1x1xf32> to vector<2x8x12xf32>
    %321 = arith.mulf %318, %320 : vector<2x8x12xf32>
    %322 = vector.shape_cast %321 : vector<2x8x12xf32> to vector<16x12xf32>
    %c760 = arith.constant 760 : index
    %c0_136 = arith.constant 0 : index
    %323 = vector.load %arg5[%c760, %c0_136] : memref<776x128xf32, #tpu.memory_space<vmem>>, vector<12x6xf32>
    %cst_137 = arith.constant dense<0.000000e+00> : vector<16x6xf32>
    %324 = tpu.matmul %322, %323, %cst_137 {dimension_numbers = #tpu.dot_dimension_numbers<[1], [0], [0], [1], [0, 0, 1, 1], [], []>} : vector<16x12xf32>, vector<12x6xf32>, vector<16x6xf32> -> vector<16x6xf32>
    %c0_138 = arith.constant 0 : index
    %c0_139 = arith.constant 0 : index
    %325 = vector.load %arg6[%c0_138, %c0_139] : memref<16x6xf32, #tpu.memory_space<vmem>>, vector<16x6xf32>
    tpu.vector_store %arg6[%c0_138, %c0_139], %324 {strides = array<i32>} : memref<16x6xf32, #tpu.memory_space<vmem>>, vector<16x6xf32>,
    return
  }
}

</mosaic_0001>

<bundles_post_ra>
// kernel: _forward_impl.1
= control target key start
LH: loop header
LB: loop body
LE: loop exit
PB: predicated region body
PF: predicated region fallthrough
CT: control target
= control target key end

     0   :  { %15 = vsyncpa [#allocation3], 0  ;;  %v3258_v1 = vmov 0   ;;  %s3948_s0 = inlined_call_operand.vmem [shape: f32[2,1], index: 0, kind: input, shape index: {}]   ;;  %s3949_s1 = inlined_call_operand.vmem [shape: f32[16,12], index: 1, kind: input, shape index: {}]   ;;  %s3950_s2 = inlined_call_operand.vmem [shape: f32[16,6], index: 2, kind: input, shape index: {}]   ;;  %s3951_s3 = inlined_call_operand.vmem [shape: f32[16,16], index: 3, kind: input, shape index: {}]   ;;  %s3952_s4 = inlined_call_operand.vmem [shape: f32[16,12], index: 4, kind: input, shape index: {}]   ;;  %s3953_s5 = inlined_call_operand.vmem [shape: f32[776,128], index: 5, kind: input, shape index: {}]   ;;  %s3954_s6 = inlined_call_operand.vmem [shape: f32[16,6], index: 6, kind: output, shape index: {0}]   ;;  %s3955_s7 = inlined_call_operand.hbm [shape: f32[16,16], index: 7, kind: output, shape index: {1}]   ;;  %s3956_s8 = inlined_call_operand.hbm [shape: f32[16,16], index: 8, kind: output, shape index: {2}]   ;;  %s3957_s9 = inlined_call_operand.vmem [shape: f32[16,12], index: 9, kind: output, shape index: {3}]  }
   0x1   :  { %v29_v0 = vld [vmem:[%s3948_s0] sm:$0x3]  ;;  %3123 = vset.pattern.permute.xlu0 %v3258_v1 }
   0x2   :  { %33 = vperm.xlu0 %3123, %v29_v0  }
   0x3   :  { %16 = vsyncpa [#allocation5], 0  ;;  %v250_v2 = vld [vmem:[%s3953_s5 + $0x10] sm:$0xf]  ;;  %vm255_vm0 = vcmask 1043456   ;;  %v3259_v3 = vmov 0.0  }
   0x4   :  { %2867 = vmatprep.subr.mxu0 %v3259_v3  ;;  %2872 = vmatprep.subr.mxu1 %v3259_v3  ;;  %v249_v4 = vld [vmem:[%s3953_s5 + $0x8] sm:$0xf]  ;;  %vm3260_vm1 = vmmov 0   ;;  %v2680_v5 = vld [vmem:[%s3953_s5] ss:$0 sm:$0xff]  ;;  %vm251_vm12 = vcmask 31744  }
   0x5   :  { %2868 = vmatpush3.msk.msra.mxu0 %vm255_vm0, %v250_v2  ;;  %2869 = vmatprep.mubr.msk.f32.mxu0 %vm3260_vm1, %v3259_v3  ;;  %v3261_v19 = vmov 683565275   ;;  %v3262_v21 = vmov 2475754826   ;;  %v3263_v24 = vmov 2131351028  }
   0x6   :  { %2873 = vmatpush3.msk.msra.mxu1 %vm255_vm0, %v249_v4  ;;  %2874 = vmatprep.mubr.msk.f32.mxu1 %vm3260_vm1, %v3259_v3  ;;  %v3264_v27 = vmov 2102212464   ;;  %v3265_v30 = vmov 920167782   ;;  %v3266_v33 = vmov 1326507024  }
   0x7   :  { %2877 = vmatprep.subr.mxu0 %v3259_v3  ;;  %s3267_s28 = smov 16   ;;  %s3271_s22 = smov 112  }
   0x8   :  { %s3272_s23 = smov 80  }
  0x7d   :  { %v34_v6 = vpop.permute.xlu0 %33 }
  0x7e   :  { %v40_v7 = vmul.f32 %v2680_v5, %v34_v6 }
  0x80   :  { %v3348_v8 = vmul.f32 6.2831855, %v40_v7 }
  0x82   :  { %v45_v9 = vand.u32 2139095040, %v3348_v8  ;;  %v42_v13 = vand.u32 2147483647, %v3348_v8  ;;  %vm44_vm9 = vcmp.lt.s32.totalorder %v3348_v8, 0 }
  0x84   :  { %v46_v10 = vshrl.u32 %v45_v9, 23  ;;  %v49_v16 = vand.u32 8388607, %v42_v13  ;;  %vm43_vm10 = vcmp.le.f32.partialorder %v42_v13, 0.7853982 }
  0x86   :  { %v2681_v11 = vadd.s32 4294967169, %v46_v10  ;;  %v50_v35 = vor.u32 8388608, %v49_v16 }
  0x88   :  { %v52_v12 = vadd.s32 1, %v2681_v11  ;;  %v90_v49 = vshll.u32 %v50_v35, 8 }
  0x8a   :  { %vm53_vm2 = vcmp.gt.s32.totalorder %v52_v12, 0 }
  0x8b   :  { %v54_v14 = vsel %vm53_vm2, %v52_v12, 0 }
  0x8c   :  { %v56_v15 = vand.u32 31, %v54_v14  ;;  %v55_v18 = vshrl.u32 %v54_v14, 5 }
  0x8e   :  { %v57_v17 = vsub.s32 32, %v56_v15  ;;  %v59_v20 = vshll.u32 %v3261_v19, %v56_v15  ;;  %v62_v22 = vshll.u32 %v3262_v21, %v56_v15  ;;  %v65_v26 = vshll.u32 %v3263_v24, %v56_v15 }
  0x8f   :  { %v68_v29 = vshll.u32 %v3264_v27, %v56_v15  ;;  %v71_v32 = vshll.u32 %v3265_v30, %v56_v15  ;;  %vm74_vm3 = vcmp.lt.s32.totalorder %v55_v18, 1  ;;  %vm77_vm4 = vcmp.lt.s32.totalorder %v55_v18, 4 }
  0x90   :  { %v60_v23 = vshrl.u32 %v3262_v21, %v57_v17  ;;  %v63_v25 = vshrl.u32 %v3263_v24, %v57_v17  ;;  %v66_v28 = vshrl.u32 %v3264_v27, %v57_v17  ;;  %v69_v31 = vshrl.u32 %v3265_v30, %v57_v17 }
  0x91   :  { %v72_v34 = vshrl.u32 %v3266_v33, %v57_v17  ;;  %v58_v44 = vshrl.u32 %v3261_v19, %v57_v17  ;;  %vm76_vm5 = vcmp.lt.s32.totalorder %v55_v18, 3  ;;  %vm75_vm6 = vcmp.lt.s32.totalorder %v55_v18, 2 }
  0x92   :  { %v61_v36 = vor.u32 %v60_v23, %v59_v20  ;;  %v64_v37 = vor.u32 %v63_v25, %v62_v22  ;;  %v67_v38 = vor.u32 %v66_v28, %v65_v26  ;;  %v70_v39 = vor.u32 %v69_v31, %v68_v29 }
  0x93   :  { %v73_v40 = vor.u32 %v72_v34, %v71_v32 }
  0x94   :  { %v79_v41 = vsel %vm77_vm4, %v67_v38, 2102212464  ;;  %v82_v42 = vsel %vm74_vm3, %v61_v36, %v64_v37  ;;  %v86_v43 = vsel %vm74_vm3, %v64_v37, %v67_v38  ;;  %v83_v45 = vsel %vm77_vm4, %v70_v39, 920167782 }
  0x95   :  { %v87_v46 = vsel %vm77_vm4, %v73_v40, 1326507024  ;;  %v84_v47 = vsel %vm76_vm5, %v67_v38, %v83_v45  ;;  %v78_v50 = vsel %vm74_vm3, %v58_v44, %v61_v36  ;;  %v80_v51 = vsel %vm76_vm5, %v64_v37, %v79_v41  ;;  %v521_v44 = vld [vmem:[%s3953_s5 + $0x28] sm:$0xff]  ;;  %v519_v45 = vld [vmem:[%s3949_s1] sm:$0xff] }
  0x96   :  { %v88_v48 = vsel %vm76_vm5, %v70_v39, %v87_v46  ;;  %v85_v52 = vsel %vm75_vm6, %v82_v42, %v84_v47  ;;  %v81_v58 = vsel %vm75_vm6, %v78_v50, %v80_v51  ;;  %vm134_vm4 = vweird.f32 %v3348_v8  ;;  %v2696_v46 = vld [vmem:[%s3953_s5 + $0x50] ss:$0 sm:$0xff]  ;;  %v520_v47 = vld [vmem:[%s3949_s1 + $0x8] sm:$0xff]  ;;  %v788_v50 = vld [vmem:[%s3953_s5 + $0x40] sm:$0xff]  ;;  %s3268_s1 = smov 48  }
  0x97   :  { %v89_v53 = vsel %vm75_vm6, %v86_v43, %v88_v48  ;;  %v3357_v56 = vmul.u32.u64.low %v90_v49, %v85_v52  ;;  %v3358_v57 = vmul.u32.u64.high %v90_v49, %v85_v52, %v3357_v56  ;;  %v97_v60 = vmul.u32 %v90_v49, %v81_v58  ;;  %v418_v43 = vld [vmem:[%s3953_s5 + $0x20] sm:$0xff]  ;;  %505 = vrot.lane.b32.xlu0 %v2696_v46, %s3267_s28  ;;  %v789_v48 = vld [vmem:[%s3953_s5 + $0x48] sm:$0xff] }
  0x98   :  { %v3354_v54 = vmul.u32.u64.low %v90_v49, %v89_v53  ;;  %v3355_v55 = vmul.u32.u64.high %v90_v49, %v89_v53, %v3354_v54  ;;  %vm523_vm5 = vcmask 97280   ;;  %v2697_v49 = vld [vmem:[%s3953_s5 + $0x78] ss:$0 sm:$0xff]  ;;  %v786_v51 = vld [vmem:[%s3951_s3] sm:$0xff]  ;;  %vm790_vm6 = vcmask 130048   ;;  %v787_v52 = vld [vmem:[%s3951_s3 + $0x8] sm:$0xff] }
  0x99   :  { %v100_v59 = vadd.s32 1, %v3358_v57 }
  0x9a   :  { %vm99_vm7 = vc.u32 %v3355_v55, %v3357_v56  ;;  %v98_v10 = vadd.s32 %v3357_v56, %v3355_v55  ;;  %v2693_v55 = vld [vmem:[%s3953_s5 + $0x18] ss:$0 sm:$0xff] }
  0x9b   :  { %v101_v61 = vsel %vm99_vm7, %v100_v59, %v3358_v57  ;;  %515 = vrot.lane.b32.xlu0 %v2697_v49, %s3268_s1  ;;  %vm419_vm7 = vcmask 64512  }
  0x9c   :  { %v102_v62 = vadd.s32 %v101_v61, %v97_v60 }
  0x9e   :  { %v103_v63 = vadd.s32 536870912, %v102_v62 }
  0xa0   :  { %v104_v0 = vshrl.u32 %v103_v63, 30 }
  0xa2   :  { %v105_v1 = vshll.u32 %v104_v0, 30  ;;  %v128_v24 = vsub.s32 4, %v104_v0 }
  0xa4   :  { %v106_v2 = vsub.s32 %v102_v62, %v105_v1  ;;  %v129_v27 = vsel %vm44_vm9, %v128_v24, %v104_v0 }
  0xa5   :  { %v131_v28 = vsel %vm43_vm10, 0, %v129_v27 }
  0xa6   :  { %v108_v4 = vsub.s32 0, %v106_v2  ;;  %v135_v29 = vadd.s32 3, %v131_v28  ;;  %v239_v30 = vand.u32 3, %v131_v28 }
  0xa8   :  { %v2682_v5 = vmin.u32 %v108_v4, %v106_v2  ;;  %v136_v31 = vand.u32 3, %v135_v29  ;;  %vm244_vm11 = vcmp.eq.s32.totalorder %v239_v30, 2  ;;  %vm241_vm14 = vcmp.eq.s32.totalorder %v239_v30, 0 }
  0xa9   :  { %vm240_vm2 = vcmp.lt.s32.totalorder %v239_v30, 2  ;;  %v3270_v4 = vmov 1966171168  }
  0xaa   :  { %v110_v6 = vclz %v2682_v5  ;;  %vm141_vm13 = vcmp.eq.s32.totalorder %v136_v31, 2  ;;  %vm138_vm15 = vcmp.eq.s32.totalorder %v136_v31, 0  ;;  %vm137_vm3 = vcmp.lt.s32.totalorder %v136_v31, 2 }
  0xab   :  { %v610_v5 = vunpack.c.l.s4 %v3270_v4 }
  0xac   :  { %v2683_v7 = vadd.s32 4294967294, %v110_v6  ;;  %v612_v6 = vlaneseq }
  0xae   :  { %vm2684_vm8 = vcmp.lt.s32.totalorder %v2683_v7, 0 }
  0xaf   :  { %v113_v9 = vsel %vm2684_vm8, 0, %v2683_v7  ;;  %vm707_vm8 = vcmask 1045504  }
  0xb0   :  { %v114_v11 = vsub.s32 32, %v113_v9  ;;  %v118_v12 = vsub.s32 4294967266, %v113_v9  ;;  %v115_v14 = vshll.u32 %v106_v2, %v113_v9  ;;  %v3269_v2 = vmov 8   ;;  %v3418_v9 = vld [vmem:[%s3953_s5 + $0x250] sm:$0x1] }
  0xb1   :  { %3125 = vset.pattern.permute.xlu0 %v3269_v2  ;;  %3124 = vset.pattern.permute.xlu1 %v3269_v2  ;;  %v1015_v2 = vld [vmem:[%s3953_s5 + $0x58] sm:$0xff] }
  0xb2   :  { %v116_v15 = vshrl.u32 %v98_v10, %v114_v11  ;;  %v119_v16 = vadd.s32 127, %v118_v12  ;;  %v611_v10 = vunpack.c.0.s8 %v610_v5  ;;  %v3420_v11 = vshrl.u32 %v612_v6, 7 }
  0xb3   :  { %v2535_v12 = vsub.f32 0.0, %v3418_v9 }
  0xb4   :  { %v117_v17 = vor.u32 %v116_v15, %v115_v14  ;;  %v120_v18 = vshll.u32 %v119_v16, 23  ;;  %v3424_v14 = vsub.s32 %v611_v10, %v3420_v11  ;;  %v2695_v15 = vld [vmem:[%s3953_s5 + $0x38] ss:$0 sm:$0xff]  ;;  %v3434_v28 = vsub.s32 0, %v3420_v11 }
  0xb6   :  { %v121_v19 = vor.u32 4788187, %v120_v18  ;;  %v124_v21 = vcvt.s32.f32 %v117_v17  ;;  %v2536_v17 = vmul.f32 1.442695, %v2535_v12 }
  0xb8   :  { %v122_v20 = vand.u32 2147483647, %v121_v19 }
  0xba   :  { %v125_v22 = vmul.f32 %v124_v21, %v122_v20 }
  0xbc   :  { %v126_v23 = vxor.u32 2147483648, %v125_v22 }
  0xbe   :  { %v127_v25 = vsel %vm44_vm9, %v126_v23, %v125_v22  ;;  %vm700_vm9 = vcmask 48128  }
  0xbf   :  { %v130_v26 = vsel %vm43_vm10, %v3348_v8, %v127_v25  ;;  %v522_v8 = vld [vmem:[%s3953_s5 + $0x30] sm:$0xf]  ;;  %vm1019_vm10 = vcmask 261120  }
  0xc0   :  { %3126 = vcosq.f32 %v130_v26  ;;  %2882 = vmatprep.subr.msk.mxu1 %vm255_vm0, %v522_v8 }
  0xc1   :  { %3128 = vsinq.f32 %v130_v26 }
  0xcd   :  { %v3127_v32 = vpop.eup %3126 }
  0xce   :  { %v3129_v33 = vpop.eup %3128  ;;  %v142_v34 = vxor.u32 2147483648, %v3127_v32 }
  0xcf   :  { %v139_v35 = vxor.u32 2147483648, %v3129_v33 }
  0xd0   :  { %v246_v36 = vsel %vm244_vm11, %v142_v34, %v3129_v33  ;;  %v143_v13 = vsel %vm141_vm13, %v142_v34, %v3129_v33  ;;  %vm1159_vm11 = vcmask 195584  }
  0xd1   :  { %v243_v37 = vsel %vm241_vm14, %v3127_v32, %v139_v35  ;;  %v140_v38 = vsel %vm138_vm15, %v3127_v32, %v139_v35 }
  0xd2   :  { %v247_v39 = vsel %vm240_vm2, %v243_v37, %v246_v36  ;;  %v144_v40 = vsel %vm137_vm3, %v140_v38, %v143_v13 }
  0xd3   :  { %v248_v41 = vsel %vm134_vm4, nan, %v247_v39  ;;  %v145_v42 = vsel %vm134_vm4, nan, %v144_v40 }
  0xd4   :  { %2870 = vmatmul.mubr.msk.f32.vlgmr.msra.gmra.mxu0 %vm251_vm12, %v248_v41  ;;  %2875 = vmatmul.mubr.msk.f32.vlgmr.msra.gmra.mxu1 %vm251_vm12, %v145_v42  ;;  %vm1515_vm12 = vcmask 523264  }
  0xd5   :  { %2879 = vmatprep.mubr.msk.f32.mxu0 %vm3260_vm1, %v3259_v3  ;;  %2878 = vmatpush3.msra.mxu0 %v418_v43 }
  0xd6   :  { %2886 = vmatprep.mubr.msk.f32.mxu1 %vm523_vm5, %v519_v45  ;;  %2883 = vmatpush3.msk.msra.mxu1 %vm255_vm0, %v522_v8 }
  0xd7   :  { %2884 = vmatprep.subr.mxu1 %v521_v44 }
  0xd8   :  { %2885 = vmatpush3.msra.mxu1 %v521_v44 }
  0xd9   :  { %2887 = vmatmul.mubr.msk.f32.vlgmr.msra.gmra.mxu1 %vm523_vm5, %v520_v47  ;;  %2894 = vmatprep.subr.mxu1 %v789_v48 }
  0xda   :  { %2895 = vmatpush3.msra.mxu1 %v789_v48  ;;  %2898 = vmatprep.mubr.msk.f32.mxu1 %vm790_vm6, %v786_v51 }
  0xdb   :  { %2896 = vmatprep.subr.mxu1 %v788_v50 }
  0xdc   :  { %2897 = vmatpush3.msra.mxu1 %v788_v50 }
  0xdd   :  { %2899 = vmatmul.mubr.msk.f32.vlgmr.msra.gmra.mxu1 %vm790_vm6, %v787_v52 }
 0x109   :  { %v506_v7 = vpop.permute.xlu0 %505 }
 0x10d   :  { %v516_v16 = vpop.permute.xlu0 %515 }
 0x194   :  { %v325_v53 = vpop.f32.mrf.mxu0  ;;  %v401_v54 = vpop.f32.mrf.mxu1 }
 0x195   :  { %v402_v56 = vadd.f32 %v401_v54, %v325_v53  ;;  %v699_v54 = vld [vmem:[%s3953_s5 + $0x258] sm:$0x3f] }
 0x196   :  { %v2871_v57 = vpop.f32.mrf.mxu0  ;;  %v2876_v58 = vpop.f32.mrf.mxu1  ;;  %2889 = vmatprep.subr.msk.mxu0 %vm707_vm8, %v699_v54 }
 0x197   :  { %v410_v59 = vadd.f32 %v2693_v55, %v402_v56  ;;  %v3458_v57 = vld [vmem:[%s3953_s5 + $0x268] sm:$0xf] }
 0x199   :  { %v411_v60 = vsub.f32 0.0, %v410_v59  ;;  %v2888_v24 = vpop.f32.mrf.mxu1 }
 0x19b   :  { %v412_v61 = vmul.f32 1.442695, %v411_v60  ;;  %v599_v33 = vpop.f32.mrf.mxu1 }
 0x19d   :  { %3130 = vpow2.f32 %v412_v61  ;;  %v1018_v61 = vld [vmem:[%s3953_s5 + $0x70] sm:$0xff] }
 0x19e   :  { %2908 = vmatprep.subr.mxu1 %v1018_v61 }
 0x19f   :  { %2909 = vmatpush3.msra.mxu1 %v1018_v61 }
 0x1aa   :  { %v3131_v62 = vpop.eup %3130 }
 0x1ab   :  { %v414_v63 = vadd.f32 1.0, %v3131_v62 }
 0x1ad   :  { %3132 = vrcp.f32 %v414_v63  ;;  %v1017_v63 = vld [vmem:[%s3953_s5 + $0x68] sm:$0xff] }
 0x1ae   :  { %3134 = vpow2.f32 %v2536_v17  ;;  %2910 = vmatprep.subr.mxu1 %v1017_v63  ;;  %v2900_v17 = vpop.f32.mrf.mxu1 }
 0x1af   :  { %2911 = vmatpush3.msra.mxu1 %v1017_v63 }
 0x1ba   :  { %v3133_v0 = vpop.eup %3132 }
 0x1bb   :  { %v417_v1 = vmul.f32 %v3133_v0, %v410_v59  ;;  %v3135_v51 = vpop.eup %3134  ;;  %v1016_v0 = vld [vmem:[%s3953_s5 + $0x60] sm:$0xff] }
 0x1bc   :  { %v2538_v55 = vadd.f32 1.0, %v3135_v51  ;;  %2912 = vmatprep.subr.mxu1 %v1016_v0  ;;  %v1399_v51 = vld [vmem:[%s3953_s5 + $0x88] sm:$0xff] }
 0x1bd   :  { %2880 = vmatmul.mubr.msk.f32.vlgmr.msra.gmra.mxu0 %vm419_vm7, %v417_v1  ;;  %v665_v19 = vrot.slane %v417_v1, %v3424_v14  ;;  %2913 = vmatpush3.msra.mxu1 %v1016_v0 }
 0x1be   :  { %2890 = vmatpush3.msk.msra.mxu0 %vm707_vm8, %v699_v54  ;;  %2914 = vmatprep.subr.mxu1 %v1015_v2 }
 0x1bf   :  { %v666_v32 = vcombine.high %v665_v19, %v665_v19  ;;  %v673_v53 = vrot.slane %v665_v19, %v3424_v14  ;;  %2901 = vmatprep.subr.msk.mxu0 %vm255_vm0, %v3458_v57  ;;  %2915 = vmatpush3.msra.mxu1 %v1015_v2 }
 0x1c1   :  { %v680_v43 = vrot.slane %v666_v32, %v3424_v14  ;;  %v684_v56 = vrot.slane %v673_v53, %v3434_v28 }
 0x1c3   :  { %v688_v49 = vrot.slane %v680_v43, %v3434_v28 }
 0x27d   :  { %v489_v18 = vpop.f32.mrf.mxu0 }
 0x27e   :  { %v498_v20 = vadd.f32 %v2695_v15, %v489_v18  ;;  %v508_v21 = vadd.f32 %v506_v7, %v489_v18  ;;  %v518_v22 = vadd.f32 %v516_v16, %v489_v18  ;;  %v863_v18 = vpop.f32.mrf.mxu1 }
 0x27f   :  { %v2881_v23 = vpop.f32.mrf.mxu0 }
 0x280   :  { %v615_v25 = vrot.slane %v498_v20, %v3424_v14  ;;  %v1108_v26 = vrot.slane %v518_v22, %v3424_v14  ;;  %v879_v27 = vrot.slane %v508_v21, %v3424_v14 }
 0x282   :  { %v1109_v29 = vcombine.high %v1108_v26, %v1108_v26  ;;  %v616_v30 = vcombine.high %v615_v25, %v615_v25  ;;  %v623_v31 = vrot.slane %v615_v25, %v3424_v14  ;;  %v887_v34 = vrot.slane %v879_v27, %v3424_v14 }
 0x283   :  { %v880_v35 = vcombine.high %v879_v27, %v879_v27  ;;  %v1116_v45 = vrot.slane %v1108_v26, %v3424_v14 }
 0x284   :  { %v630_v36 = vrot.slane %v616_v30, %v3424_v14  ;;  %v634_v13 = vrot.slane %v623_v31, %v3434_v28  ;;  %v1123_v37 = vrot.slane %v1109_v29, %v3424_v14  ;;  %v898_v38 = vrot.slane %v887_v34, %v3434_v28  ;;  %v657_v29 = vld [vmem:[%s3950_s2] sm:$0xff]  ;;  %v658_v31 = vld [vmem:[%s3950_s2 + $0x8] sm:$0xff]  ;;  %s3273_s2 = smov [#allocation2]  }
 0x285   :  { %v894_v39 = vrot.slane %v880_v35, %v3424_v14  ;;  %v1127_v52 = vrot.slane %v1116_v45, %v3434_v28  ;;  %v925_v34 = vld [vmem:[%s3952_s4] sm:$0xff]  ;;  %s2647_s20 = sshll.u32 %s3273_s2, 4  ;;  %s2648_s20 = int_to_ptr.vmem [resolvable:$true] %s2647_s20 }
 0x286   :  { %v638_v40 = vrot.slane %v630_v36, %v3434_v28  ;;  %v641_v41 = vadd.f32 %v634_v13, %v599_v33  ;;  %v1131_v42 = vrot.slane %v1123_v37, %v3434_v28  ;;  %903 = vrot.lane.b32.xlu1 %v898_v38, %s3271_s22  ;;  %v926_v38 = vld [vmem:[%s3952_s4 + $0x8] sm:$0xff]  ;;  %s3214_s4 = scalar_lea.vmem %s2648_s20, 256  ;;  %p3219_p1 = scmp.lt.s32.totalorder %s2648_s20, %s2648_s20 }
 0x287   :  { %v902_v46 = vrot.slane %v894_v39, %v3434_v28  ;;  %p3215_p0 = scmp.ne.s32.totalorder %s2648_s20, %s3214_s4  ;;  %p3220_p2 = scmp.lt.s32.totalorder %s3214_s4, %s3214_s4 }
 0x288   :  { %v642_v8 = vadd.f32 %v2888_v24, %v638_v40  ;;  %v643_v44 = vsub.f32 0.0, %v641_v41  ;;  %1134 = vrot.lane.b32.xlu0 %v1131_v42, %s3272_s23  ;;  %v929_v40 = vld [vmem:[%s3953_s5 + $0x260] sm:$0xff] }
 0x289   :  { %p3221_p3 = por %p3220_p2, %p3219_p1 }
 0x28a   :  { %v644_v47 = vsub.f32 0.0, %v642_v8  ;;  %v645_v48 = vmul.f32 1.442695, %v643_v44  ;;  %905 = vrot.lane.b32.xlu1 %v902_v46, %s3271_s22  ;;  %v1158_v46 = vld [vmem:[%s3953_s5 + $0x280] sm:$0xff] }
 0x28b   :  { %p3222_p4 = pnand %p3221_p3, %p3215_p0 }
 0x28c   :  { %v647_v50 = vmul.f32 1.442695, %v644_v47  ;;  %3136 = vpow2.f32 %v645_v48  ;;  %694 = vperm.xlu0 %3125, %v688_v49   ;;  %v1157_v47 = vld [vmem:[%s3953_s5 + $0x278] sm:$0xff]  ;;  %v1156_v48 = vld [vmem:[%s3953_s5 + $0x270] sm:$0xff] }
 0x28d   :  { %v1401_v49 = vld [vmem:[%s3953_s5 + $0x98] sm:$0xff] }
 0x28e   :  { %3138 = vpow2.f32 %v647_v50  ;;  %1132 = vrot.lane.b32.xlu1 %v1127_v52, %s3272_s23  ;;  %2928 = vmatprep.subr.mxu1 %v1401_v49  ;;  %v1400_v50 = vld [vmem:[%s3953_s5 + $0x90] sm:$0xff]  ;;  %v1398_v52 = vld [vmem:[%s3953_s5 + $0x80] sm:$0xff] }
 0x28f   :  { %3140 = vrcp.f32 %v2538_v55 }
 0x292   :  { %690 = vperm.xlu1 %3124, %v684_v56  }
 0x299   :  { %v3137_v58 = vpop.eup %3136 }
 0x29a   :  { %v649_v59 = vadd.f32 1.0, %v3137_v58 }
 0x29b   :  { %v3139_v60 = vpop.eup %3138 }
 0x29c   :  { %v650_v62 = vadd.f32 1.0, %v3139_v60  ;;  %3142 = vrcp.f32 %v649_v59  ;;  %v3141_v1 = vpop.eup %3140 }
 0x29d   :  { %v2541_v4 = vmul.f32 %v3141_v1, %v3418_v9 }
 0x29e   :  { %3144 = vrcp.f32 %v650_v62 }
 0x29f   :  { %v2545_v5 = vrot.slane %v2541_v4, %v3434_v28 }
 0x2a9   :  { %v3143_v6 = vpop.eup %3142 }
 0x2aa   :  { %v655_v7 = vmul.f32 %v3143_v6, %v641_v41 }
 0x2ab   :  { %v3145_v10 = vpop.eup %3144 }
 0x2ac   :  { %v656_v12 = vmul.f32 %v3145_v10, %v642_v8  ;;  %v2546_v15 = vadd.f32 %v2545_v5, %v655_v7 }
 0x2ae   :  { %v2547_v16 = vadd.f32 %v2545_v5, %v656_v12  ;;  %2548 = vst.msk [vmem:[#allocation2] sm:$0xff] %vm790_vm6, %v2546_v15 }
 0x2b0   :  { %2549 = vst.msk [vmem:[#allocation2 + $0x8] sm:$0xff] %vm790_vm6, %v2547_v16 }
 0x2f8   :  { %v904_v19 = vpop.permute.xlu1 %903 }
 0x2f9   :  { %v909_v20 = vadd.f32 %v904_v19, %v863_v18  ;;  %v1509_v19 = vld [vmem:[%s3953_s5 + $0xe0] sm:$0xff] }
 0x2fa   :  { %v3478_v26 = vpop.permute.xlu0 %1134 }
 0x2fb   :  { %v911_v21 = vsub.f32 0.0, %v909_v20 }
 0x2fc   :  { %v906_v22 = vpop.permute.xlu1 %905 }
 0x2fd   :  { %v913_v23 = vmul.f32 1.442695, %v911_v21  ;;  %v910_v9 = vadd.f32 %v2900_v17, %v906_v22  ;;  %v1507_v21 = vld [vmem:[%s3953_s5 + $0xd0] sm:$0xff]  ;;  %v1506_v22 = vld [vmem:[%s3953_s5 + $0xc8] sm:$0xff] }
 0x2ff   :  { %3146 = vpow2.f32 %v913_v23  ;;  %v912_v24 = vsub.f32 0.0, %v910_v9  ;;  %v1505_v23 = vld [vmem:[%s3953_s5 + $0xc0] sm:$0xff] }
 0x300   :  { %v3480_v27 = vpop.permute.xlu1 %1132 }
 0x301   :  { %v915_v25 = vmul.f32 1.442695, %v912_v24  ;;  %v1503_v24 = vld [vmem:[%s3953_s5 + $0xb0] sm:$0xff] }
 0x303   :  { %3148 = vpow2.f32 %v915_v25  ;;  %v1502_v25 = vld [vmem:[%s3953_s5 + $0xa8] sm:$0xff] }
 0x307   :  { %v3488_v32 = vpop.permute.xlu0 %694 }
 0x308   :  { %v698_v13 = vmul.f32 %v3488_v32, %v658_v31  ;;  %v928_v42 = vmul.f32 %v926_v38, %v3488_v32 }
 0x30c   :  { %v3147_v30 = vpop.eup %3146 }
 0x30d   :  { %v917_v33 = vadd.f32 1.0, %v3147_v30  ;;  %v3493_v35 = vpop.permute.xlu1 %690 }
 0x30e   :  { %v697_v36 = vmul.f32 %v3493_v35, %v657_v29  ;;  %v927_v39 = vmul.f32 %v925_v34, %v3493_v35 }
 0x30f   :  { %3150 = vrcp.f32 %v917_v33 }
 0x310   :  { %v3149_v37 = vpop.eup %3148  ;;  %2891 = vmatprep.mubr.msk.f32.mxu0 %vm700_vm9, %v697_v36 }
 0x311   :  { %v918_v41 = vadd.f32 1.0, %v3149_v37  ;;  %2892 = vmatmul.mubr.msk.f32.vlgmr.msra.gmra.mxu0 %vm700_vm9, %v698_v13 }
 0x312   :  { %2902 = vmatpush3.msk.msra.mxu0 %vm255_vm0, %v3458_v57  ;;  %2905 = vmatprep.mubr.msk.f32.mxu0 %vm523_vm5, %v927_v39 }
 0x313   :  { %3152 = vrcp.f32 %v918_v41  ;;  %2903 = vmatprep.subr.mxu0 %v929_v40 }
 0x314   :  { %2904 = vmatpush3.msra.mxu0 %v929_v40 }
 0x315   :  { %2906 = vmatmul.mubr.msk.f32.vlgmr.msra.gmra.mxu0 %vm523_vm5, %v928_v42  ;;  %2919 = vmatprep.subr.mxu0 %v1158_v46 }
 0x316   :  { %2920 = vmatpush3.msra.mxu0 %v1158_v46  ;;  %v1618_v46 = vld [vmem:[%s3953_s5 + $0x128] sm:$0xff] }
 0x317   :  { %2921 = vmatprep.subr.mxu0 %v1157_v47 }
 0x318   :  { %2922 = vmatpush3.msra.mxu0 %v1157_v47  ;;  %v1617_v47 = vld [vmem:[%s3953_s5 + $0x120] sm:$0xff] }
 0x319   :  { %2923 = vmatprep.subr.mxu0 %v1156_v48 }
 0x31a   :  { %2924 = vmatpush3.msra.mxu0 %v1156_v48  ;;  %v1616_v48 = vld [vmem:[%s3953_s5 + $0x118] sm:$0xff] }
 0x31b   :  { %2939 = vmatprep.subr.mxu0 %v1509_v19 }
 0x31c   :  { %v3151_v43 = vpop.eup %3150 }
 0x31d   :  { %v3511_v8 = vmul.f32 %v3151_v43, %v909_v20  ;;  %v1508_v20 = vld [vmem:[%s3953_s5 + $0xd8] sm:$0xff] }
 0x31f   :  { %2916 = vmatprep.mubr.msk.f32.mxu1 %vm1019_vm10, %v3511_v8 }
 0x320   :  { %v3153_v44 = vpop.eup %3152 }
 0x321   :  { %v3515_v45 = vmul.f32 %v3153_v44, %v910_v9  ;;  %v1504_v9 = vld [vmem:[%s3953_s5 + $0xb8] sm:$0xff] }
 0x323   :  { %2917 = vmatmul.mubr.msk.f32.vlgmr.msra.gmra.mxu1 %vm1019_vm10, %v3515_v45 }
 0x324   :  { %2929 = vmatpush3.msra.mxu1 %v1401_v49  ;;  %v1615_v49 = vld [vmem:[%s3953_s5 + $0x110] sm:$0xff] }
 0x325   :  { %2930 = vmatprep.subr.mxu1 %v1400_v50 }
 0x326   :  { %2931 = vmatpush3.msra.mxu1 %v1400_v50  ;;  %v1614_v50 = vld [vmem:[%s3953_s5 + $0x108] sm:$0xff] }
 0x327   :  { %2932 = vmatprep.subr.mxu1 %v1399_v51 }
 0x328   :  { %2933 = vmatpush3.msra.mxu1 %v1399_v51  ;;  %v1613_v51 = vld [vmem:[%s3953_s5 + $0x100] sm:$0xff] }
 0x329   :  { %2934 = vmatprep.subr.mxu1 %v1398_v52 }
 0x32a   :  { %2935 = vmatpush3.msra.mxu1 %v1398_v52  ;;  %v1612_v52 = vld [vmem:[%s3953_s5 + $0xf8] sm:$0xff] }
 0x32b   :  { %2958 = vmatprep.subr.mxu1 %v1618_v46 }
 0x3d1   :  { %v3540_v53 = vpop.f32.mrf.mxu0 }
 0x3d3   :  { %v3542_v54 = vpop.f32.mrf.mxu0 }
 0x3d5   :  { %v3544_v55 = vpop.f32.mrf.mxu0 }
 0x3d6   :  { %v1155_v58 = vmul.f32 %v3544_v55, %v3488_v32 }
 0x3d7   :  { %v3546_v56 = vpop.f32.mrf.mxu0 }
 0x3d8   :  { %v1154_v57 = vmul.f32 %v3546_v56, %v3493_v35 }
 0x3da   :  { %2925 = vmatprep.mubr.msk.f32.mxu0 %vm1159_vm11, %v1154_v57  ;;  %v1611_v57 = vld [vmem:[%s3953_s5 + $0xf0] sm:$0xff] }
 0x3db   :  { %2926 = vmatmul.mubr.msk.f32.vlgmr.msra.gmra.mxu0 %vm1159_vm11, %v1155_v58 }
 0x3dc   :  { %2940 = vmatpush3.msra.mxu0 %v1509_v19 }
 0x3dd   :  { %2941 = vmatprep.subr.mxu0 %v1508_v20 }
 0x3de   :  { %2942 = vmatpush3.msra.mxu0 %v1508_v20 }
 0x3df   :  { %2943 = vmatprep.subr.mxu0 %v1507_v21 }
 0x3e0   :  { %2944 = vmatpush3.msra.mxu0 %v1507_v21 }
 0x3e1   :  { %2945 = vmatprep.subr.mxu0 %v1506_v22 }
 0x3e2   :  { %2946 = vmatpush3.msra.mxu0 %v1506_v22 }
 0x3e3   :  { %v2918_v59 = vpop.f32.mrf.mxu1  ;;  %2947 = vmatprep.subr.mxu0 %v1505_v23 }
 0x3e4   :  { %v1139_v60 = vadd.f32 %v2918_v59, %v3478_v26  ;;  %2948 = vmatpush3.msra.mxu0 %v1505_v23  ;;  %v2713_v26 = vld [vmem:[%s3953_s5 + $0xa0] ss:$0 sm:$0xff] }
 0x3e5   :  { %v1092_v61 = vpop.f32.mrf.mxu1  ;;  %2949 = vmatprep.subr.mxu0 %v1504_v9 }
 0x3e6   :  { %v1141_v62 = vsub.f32 0.0, %v1139_v60  ;;  %v1138_v63 = vadd.f32 %v3480_v27, %v1092_v61  ;;  %2950 = vmatpush3.msra.mxu0 %v1504_v9 }
 0x3e7   :  { %2951 = vmatprep.subr.mxu0 %v1503_v24 }
 0x3e8   :  { %v1144_v0 = vmul.f32 1.442695, %v1141_v62  ;;  %v1140_v1 = vsub.f32 0.0, %v1138_v63  ;;  %2952 = vmatpush3.msra.mxu0 %v1503_v24 }
 0x3e9   :  { %2953 = vmatprep.subr.mxu0 %v1502_v25 }
 0x3ea   :  { %3154 = vpow2.f32 %v1144_v0  ;;  %v1142_v2 = vmul.f32 1.442695, %v1140_v1  ;;  %2954 = vmatpush3.msra.mxu0 %v1502_v25 }
 0x3eb   :  { %2977 = vmatprep.subr.mxu0 %v3259_v3 }
 0x3ec   :  { %3156 = vpow2.f32 %v1142_v2 }
 0x3f7   :  { %v3155_v4 = vpop.eup %3154 }
 0x3f8   :  { %v1147_v5 = vadd.f32 1.0, %v3155_v4 }
 0x3f9   :  { %v3157_v6 = vpop.eup %3156 }
 0x3fa   :  { %3158 = vrcp.f32 %v1147_v5  ;;  %v1146_v7 = vadd.f32 1.0, %v3157_v6 }
 0x3fc   :  { %3160 = vrcp.f32 %v1146_v7 }
 0x407   :  { %v3159_v10 = vpop.eup %3158 }
 0x408   :  { %v3556_v12 = vmul.f32 %v3159_v10, %v1139_v60  ;;  %v2716_v60 = vld [vmem:[%s3953_s5 + $0xe8] ss:$0 sm:$0xff] }
 0x409   :  { %v3161_v15 = vpop.eup %3160 }
 0x40a   :  { %v3558_v16 = vmul.f32 %v3161_v15, %v1138_v63  ;;  %v1244_v17 = vsel %vm1019_vm10, %v3556_v12, 0.0 }
 0x40b   :  { %1245 = vadd.xlane.f32.xlu0 %v1244_v17 }
 0x40c   :  { %2936 = vmatprep.mubr.msk.f32.mxu1 %vm1019_vm10, %v3558_v16  ;;  %v1241_v18 = vsel %vm1019_vm10, %v3558_v16, 0.0 }
 0x40d   :  { %1242 = vadd.xlane.f32.xlu1 %v1241_v18  ;;  %2937 = vmatmul.mubr.msk.f32.vlgmr.msra.gmra.mxu1 %vm1019_vm10, %v3556_v12 }
 0x40e   :  { %2959 = vmatpush3.msra.mxu1 %v1618_v46 }
 0x40f   :  { %2960 = vmatprep.subr.mxu1 %v1617_v47 }
 0x410   :  { %2961 = vmatpush3.msra.mxu1 %v1617_v47 }
 0x411   :  { %2962 = vmatprep.subr.mxu1 %v1616_v48 }
 0x412   :  { %2963 = vmatpush3.msra.mxu1 %v1616_v48 }
 0x413   :  { %2964 = vmatprep.subr.mxu1 %v1615_v49 }
 0x414   :  { %2965 = vmatpush3.msra.mxu1 %v1615_v49 }
 0x415   :  { %2966 = vmatprep.subr.mxu1 %v1614_v50 }
 0x416   :  { %2967 = vmatpush3.msra.mxu1 %v1614_v50 }
 0x417   :  { %2968 = vmatprep.subr.mxu1 %v1613_v51 }
 0x418   :  { %2969 = vmatpush3.msra.mxu1 %v1613_v51 }
 0x419   :  { %2970 = vmatprep.subr.mxu1 %v1612_v52 }
 0x41a   :  { %2971 = vmatpush3.msra.mxu1 %v1612_v52 }
 0x41b   :  { %2972 = vmatprep.subr.mxu1 %v1611_v57 }
 0x41c   :  { %2973 = vmatpush3.msra.mxu1 %v1611_v57 }
 0x494   :  { %v1246_v6 = vpop.xlane.xlu0 %1245 }
 0x495   :  { %v1256_v10 = vrot.slane %v1246_v6, 4 }
 0x496   :  { %v1243_v7 = vpop.xlane.xlu1 %1242 }
 0x497   :  { %v1250_v15 = vrot.slane %v1243_v7, 4  ;;  %v1257_v17 = vmax.f32 %v1246_v6, %v1256_v10 }
 0x499   :  { %v1251_v18 = vmax.f32 %v1243_v7, %v1250_v15  ;;  %v1258_v20 = vrot.slane %v1257_v17, 2 }
 0x49b   :  { %v3630_v58 = vpop.f32.mrf.mxu0  ;;  %v1252_v23 = vrot.slane %v1251_v18, 2  ;;  %v1259_v24 = vmax.f32 %v1257_v17, %v1258_v20 }
 0x49d   :  { %v3632_v59 = vpop.f32.mrf.mxu0  ;;  %v1253_v25 = vmax.f32 %v1251_v18, %v1252_v23 }
 0x4cd   :  { %v2938_v27 = vpop.f32.mrf.mxu1 }
 0x4ce   :  { %v1485_v29 = vadd.f32 %v2938_v27, %v2713_v26  ;;  %v1254_v27 = vrot.slane %v1253_v25, 1 }
 0x4cf   :  { %v1479_v30 = vpop.f32.mrf.mxu1 }
 0x4d0   :  { %v1489_v31 = vsub.f32 0.0, %v1485_v29  ;;  %v1480_v33 = vadd.f32 %v2713_v26, %v1479_v30  ;;  %v1260_v26 = vrot.slane %v1259_v24, 1  ;;  %v1255_v30 = vmax.f32 %v1253_v25, %v1254_v27 }
 0x4d2   :  { %v1492_v34 = vmul.f32 1.442695, %v1489_v31  ;;  %v1488_v36 = vsub.f32 0.0, %v1480_v33  ;;  %v3638_v31 = vcvt.s32.f32 %v3420_v11  ;;  %vm1262_vm13 = vcmp.eq.f32.partialorder %v1243_v7, %v1255_v30 }
 0x4d4   :  { %3162 = vpow2.f32 %v1492_v34  ;;  %v1490_v13 = vmul.f32 1.442695, %v1488_v36 }
 0x4d6   :  { %3164 = vpow2.f32 %v1490_v13 }
 0x4e1   :  { %v3163_v37 = vpop.eup %3162 }
 0x4e2   :  { %v1495_v38 = vadd.f32 1.0, %v3163_v37 }
 0x4e3   :  { %v3165_v39 = vpop.eup %3164 }
 0x4e4   :  { %v1494_v40 = vadd.f32 1.0, %v3165_v39  ;;  %3166 = vrcp.f32 %v1495_v38  ;;  %v1264_v38 = vsel %vm1262_vm13, %v3638_v31, 8.0 }
 0x4e5   :  { %v1266_v39 = vrot.slane %v1264_v38, 4 }
 0x4e6   :  { %3168 = vrcp.f32 %v1494_v40 }
 0x4f1   :  { %v3167_v41 = vpop.eup %3166 }
 0x4f2   :  { %v3598_v44 = vmul.f32 %v3167_v41, %v1485_v29  ;;  %v1261_v29 = vmax.f32 %v1259_v24, %v1260_v26  ;;  %v1267_v41 = vmin.f32 %v1264_v38, %v1266_v39 }
 0x4f3   :  { %v3169_v42 = vpop.eup %3168 }
 0x4f4   :  { %v3596_v43 = vmul.f32 %v3169_v42, %v1480_v33  ;;  %v1268_v46 = vrot.slane %v1267_v41, 2 }
 0x4f6   :  { %2955 = vmatprep.mubr.msk.f32.mxu0 %vm1515_vm12, %v3596_v43  ;;  %v1269_v48 = vmin.f32 %v1267_v41, %v1268_v46 }
 0x4f7   :  { %2956 = vmatmul.mubr.msk.f32.vlgmr.msra.gmra.mxu0 %vm1515_vm12, %v3598_v44 }
 0x4f8   :  { %2993 = vmatprep.mubr.msk.f32.mxu0 %vm3260_vm1, %v3259_v3  ;;  %vm1263_vm1 = vcmp.eq.f32.partialorder %v1246_v6, %v1261_v29  ;;  %v1270_v50 = vrot.slane %v1269_v48, 1 }
 0x4f9   :  { %v1265_v13 = vsel %vm1263_vm1, %v3638_v31, 8.0 }
 0x4fa   :  { %v1272_v11 = vrot.slane %v1265_v13, 4  ;;  %v1271_v52 = vmin.f32 %v1269_v48, %v1270_v50 }
 0x4fc   :  { %v1273_v40 = vmin.f32 %v1265_v13, %v1272_v11  ;;  %vm1278_vm15 = vcmp.eq.f32.partialorder %v3638_v31, %v1271_v52 }
 0x4fe   :  { %v1274_v42 = vrot.slane %v1273_v40, 2 }
 0x500   :  { %v1275_v47 = vmin.f32 %v1273_v40, %v1274_v42  ;;  %v1744_v42 = vld [vmem:[%s3953_s5 + $0x170] sm:$0xff] }
 0x501   :  { %2978 = vmatpush3.msra.mxu0 %v1744_v42 }
 0x502   :  { %v1276_v49 = vrot.slane %v1275_v47, 1  ;;  %2979 = vmatprep.subr.mxu0 %v3259_v3 }
 0x504   :  { %v1277_v51 = vmin.f32 %v1275_v47, %v1276_v49  ;;  %v1743_v47 = vld [vmem:[%s3953_s5 + $0x168] sm:$0xff]  ;;  %v1742_v49 = vld [vmem:[%s3953_s5 + $0x160] sm:$0xff] }
 0x505   :  { %2980 = vmatpush3.msra.mxu0 %v1743_v47 }
 0x506   :  { %vm1279_vm14 = vcmp.eq.f32.partialorder %v3638_v31, %v1277_v51  ;;  %2981 = vmatprep.subr.mxu0 %v3259_v3  ;;  %v1741_v51 = vld [vmem:[%s3953_s5 + $0x158] sm:$0xff] }
 0x507   :  { %v3653_v57 = vsel %vm1279_vm14, 1.0, %v3259_v3  ;;  %2982 = vmatpush3.msra.mxu0 %v1742_v49 }
 0x508   :  { %vm1285_vm2 = vcmp.gt.f32.partialorder %v3653_v57, 0.0  ;;  %2983 = vmatprep.subr.mxu0 %v3259_v3 }
 0x509   :  { %2984 = vmatpush3.msra.mxu0 %v1741_v51 }
 0x50a   :  { %2985 = vmatprep.subr.mxu0 %v3259_v3 }
 0x5b7   :  { %v2957_v61 = vpop.f32.mrf.mxu0 }
 0x5b8   :  { %v1594_v62 = vadd.f32 %v2957_v61, %v2716_v60  ;;  %v1287_v61 = vsel %vm1285_vm2, -inf, %v1246_v6 }
 0x5b9   :  { %v1588_v63 = vpop.f32.mrf.mxu0 }
 0x5ba   :  { %v1598_v0 = vsub.f32 0.0, %v1594_v62  ;;  %v1589_v1 = vadd.f32 %v2716_v60, %v1588_v63  ;;  %v3656_v60 = vsel %vm1278_vm15, 1.0, %v3259_v3  ;;  %v1294_v63 = vrot.slane %v1287_v61, 4 }
 0x5bb   :  { %vm1284_vm3 = vcmp.gt.f32.partialorder %v3656_v60, 0.0 }
 0x5bc   :  { %v1601_v2 = vmul.f32 1.442695, %v1598_v0  ;;  %v1597_v4 = vsub.f32 0.0, %v1589_v1 }
 0x5be   :  { %3170 = vpow2.f32 %v1601_v2  ;;  %v1599_v5 = vmul.f32 1.442695, %v1597_v4 }
 0x5c0   :  { %3172 = vpow2.f32 %v1599_v5 }
 0x5cb   :  { %v3171_v19 = vpop.eup %3170 }
 0x5cc   :  { %v1604_v21 = vadd.f32 1.0, %v3171_v19 }
 0x5cd   :  { %v3173_v22 = vpop.eup %3172 }
 0x5ce   :  { %v1603_v9 = vadd.f32 1.0, %v3173_v22  ;;  %3174 = vrcp.f32 %v1604_v21 }
 0x5d0   :  { %3176 = vrcp.f32 %v1603_v9 }
 0x5db   :  { %v3175_v33 = vpop.eup %3174 }
 0x5dc   :  { %v3643_v37 = vmul.f32 %v3175_v33, %v1594_v62  ;;  %v1286_v62 = vsel %vm1284_vm3, -inf, %v1243_v7 }
 0x5dd   :  { %v3177_v34 = vpop.eup %3176  ;;  %v1288_v0 = vrot.slane %v1286_v62, 4 }
 0x5de   :  { %v3640_v36 = vmul.f32 %v3177_v34, %v1589_v1  ;;  %v1295_v1 = vmax.f32 %v1287_v61, %v1294_v63  ;;  %v1739_v63 = vld [vmem:[%s3953_s5 + $0x148] sm:$0xff] }
 0x5df   :  { %v1289_v2 = vmax.f32 %v1286_v62, %v1288_v0  ;;  %v1738_v0 = vld [vmem:[%s3953_s5 + $0x140] sm:$0xff] }
 0x5e0   :  { %2974 = vmatprep.mubr.msk.f32.mxu1 %vm1515_vm12, %v3640_v36  ;;  %v1296_v4 = vrot.slane %v1295_v1, 2 }
 0x5e1   :  { %2975 = vmatmul.mubr.msk.f32.vlgmr.msra.gmra.mxu1 %vm1515_vm12, %v3643_v37  ;;  %v1290_v5 = vrot.slane %v1289_v2, 2 }
 0x5e2   :  { %v1297_v10 = vmax.f32 %v1295_v1, %v1296_v4 }
 0x5e3   :  { %v1291_v15 = vmax.f32 %v1289_v2, %v1290_v5  ;;  %v1737_v2 = vld [vmem:[%s3953_s5 + $0x138] sm:$0xff]  ;;  %v3705_v5 = vld [vmem:[%s3953_s5 + $0x220] sm:$0xff] }
 0x5e4   :  { %v1298_v17 = vrot.slane %v1297_v10, 1 }
 0x5e5   :  { %v1292_v18 = vrot.slane %v1291_v15, 1 }
 0x5e6   :  { %v1299_v19 = vmax.f32 %v1297_v10, %v1298_v17 }
 0x5e7   :  { %v1293_v20 = vmax.f32 %v1291_v15, %v1292_v18 }
 0x5e8   :  { %vm1301_vm4 = vcmp.eq.f32.partialorder %v1287_v61, %v1299_v19 }
 0x5e9   :  { %vm1300_vm7 = vcmp.eq.f32.partialorder %v1286_v62, %v1293_v20  ;;  %v1303_v21 = vsel %vm1301_vm4, %v3638_v31, 8.0 }
 0x5ea   :  { %v1302_v22 = vsel %vm1300_vm7, %v3638_v31, 8.0  ;;  %v1310_v6 = vrot.slane %v1303_v21, 4 }
 0x5eb   :  { %v1304_v7 = vrot.slane %v1302_v22, 4 }
 0x5ec   :  { %v1311_v23 = vmin.f32 %v1303_v21, %v1310_v6 }
 0x5ed   :  { %v1305_v9 = vmin.f32 %v1302_v22, %v1304_v7 }
 0x5ee   :  { %v1312_v24 = vrot.slane %v1311_v23, 2 }
 0x5ef   :  { %v1306_v25 = vrot.slane %v1305_v9, 2 }
 0x5f0   :  { %v1313_v26 = vmin.f32 %v1311_v23, %v1312_v24 }
 0x5f1   :  { %v1307_v27 = vmin.f32 %v1305_v9, %v1306_v25 }
 0x5f2   :  { %v1314_v29 = vrot.slane %v1313_v26, 1 }
 0x5f3   :  { %v1308_v30 = vrot.slane %v1307_v27, 1 }
 0x5f4   :  { %v1315_v33 = vmin.f32 %v1313_v26, %v1314_v29 }
 0x5f5   :  { %v1309_v34 = vmin.f32 %v1307_v27, %v1308_v30 }
 0x5f6   :  { %vm1317_vm8 = vcmp.eq.f32.partialorder %v3638_v31, %v1315_v33 }
 0x5f7   :  { %vm1316_vm1 = vcmp.eq.f32.partialorder %v3638_v31, %v1309_v34  ;;  %v3665_v13 = vsel %vm1317_vm8, 1.0, %v3259_v3 }
 0x5f8   :  { %v3668_v38 = vsel %vm1316_vm1, 1.0, %v3259_v3  ;;  %vm1323_vm13 = vcmp.gt.f32.partialorder %v3665_v13, 0.0 }
 0x5f9   :  { %vm1322_vm14 = vcmp.gt.f32.partialorder %v3668_v38, 0.0  ;;  %v1325_v11 = vsel %vm1323_vm13, -inf, %v1287_v61  ;;  %v1740_v61 = vld [vmem:[%s3953_s5 + $0x150] sm:$0xff] }
 0x5fa   :  { %v1324_v39 = vsel %vm1322_vm14, -inf, %v1286_v62  ;;  %v1332_v40 = vrot.slane %v1325_v11, 4  ;;  %2986 = vmatpush3.msra.mxu0 %v1740_v61 }
 0x5fb   :  { %v1326_v41 = vrot.slane %v1324_v39, 4  ;;  %2987 = vmatprep.subr.mxu0 %v3259_v3 }
 0x5fc   :  { %v1333_v46 = vmax.f32 %v1325_v11, %v1332_v40  ;;  %2988 = vmatpush3.msra.mxu0 %v1739_v63  ;;  %v2719_v63 = vld [vmem:[%s3953_s5 + $0x130] ss:$0 sm:$0xff] }
 0x5fd   :  { %v1327_v48 = vmax.f32 %v1324_v39, %v1326_v41  ;;  %2989 = vmatprep.subr.mxu0 %v3259_v3 }
 0x5fe   :  { %v1334_v50 = vrot.slane %v1333_v46, 2  ;;  %2990 = vmatpush3.msra.mxu0 %v1738_v0 }
 0x5ff   :  { %v1328_v52 = vrot.slane %v1327_v48, 2  ;;  %2991 = vmatprep.subr.mxu0 %v3259_v3 }
 0x600   :  { %v1335_v62 = vmax.f32 %v1333_v46, %v1334_v50  ;;  %2992 = vmatpush3.msra.mxu0 %v1737_v2 }
 0x601   :  { %v1329_v1 = vmax.f32 %v1327_v48, %v1328_v52  ;;  %3015 = vmatprep.subr.mxu0 %v3705_v5 }
 0x602   :  { %v1336_v4 = vrot.slane %v1335_v62, 1 }
 0x603   :  { %v1330_v10 = vrot.slane %v1329_v1, 1 }
 0x604   :  { %v1337_v15 = vmax.f32 %v1335_v62, %v1336_v4 }
 0x605   :  { %v1331_v17 = vmax.f32 %v1329_v1, %v1330_v10 }
 0x606   :  { %vm1339_vm15 = vcmp.eq.f32.partialorder %v1325_v11, %v1337_v15 }
 0x607   :  { %vm1338_vm2 = vcmp.eq.f32.partialorder %v1324_v39, %v1331_v17  ;;  %v1341_v18 = vsel %vm1339_vm15, %v3638_v31, 8.0 }
 0x608   :  { %v1340_v19 = vsel %vm1338_vm2, %v3638_v31, 8.0  ;;  %v1348_v20 = vrot.slane %v1341_v18, 4  ;;  %vm1752_vm2 = vcmask 1041409  }
 0x609   :  { %v1342_v21 = vrot.slane %v1340_v19, 4 }
 0x60a   :  { %v1349_v22 = vmin.f32 %v1341_v18, %v1348_v20 }
 0x60b   :  { %v1343_v6 = vmin.f32 %v1340_v19, %v1342_v21 }
 0x60c   :  { %v1350_v7 = vrot.slane %v1349_v22, 2 }
 0x60d   :  { %v1344_v23 = vrot.slane %v1343_v6, 2 }
 0x60e   :  { %v1351_v9 = vmin.f32 %v1349_v22, %v1350_v7 }
 0x60f   :  { %v1345_v24 = vmin.f32 %v1343_v6, %v1344_v23 }
 0x610   :  { %v1352_v25 = vrot.slane %v1351_v9, 1 }
 0x611   :  { %v1346_v26 = vrot.slane %v1345_v24, 1 }
 0x612   :  { %v1353_v27 = vmin.f32 %v1351_v9, %v1352_v25 }
 0x613   :  { %v1347_v29 = vmin.f32 %v1345_v24, %v1346_v26 }
 0x614   :  { %vm1355_vm3 = vcmp.eq.f32.partialorder %v3638_v31, %v1353_v27 }
 0x615   :  { %vm1354_vm4 = vcmp.eq.f32.partialorder %v3638_v31, %v1347_v29  ;;  %v3714_v30 = vsel %vm1355_vm3, 1.0, %v3259_v3 }
 0x616   :  { %v3717_v33 = vsel %vm1354_vm4, 1.0, %v3259_v3  ;;  %vm1361_vm7 = vcmp.gt.f32.partialorder %v3714_v30, 0.0 }
 0x617   :  { %vm1360_vm8 = vcmp.gt.f32.partialorder %v3717_v33, 0.0  ;;  %v1363_v34 = vsel %vm1361_vm7, -inf, %v1325_v11 }
 0x618   :  { %v1362_v40 = vsel %vm1360_vm8, -inf, %v1324_v39  ;;  %v1370_v41 = vrot.slane %v1363_v34, 4 }
 0x619   :  { %v1364_v42 = vrot.slane %v1362_v40, 4 }
 0x61a   :  { %v1371_v46 = vmax.f32 %v1363_v34, %v1370_v41 }
 0x61b   :  { %v1365_v47 = vmax.f32 %v1362_v40, %v1364_v42 }
 0x61c   :  { %v1372_v48 = vrot.slane %v1371_v46, 2 }
 0x61d   :  { %v1366_v49 = vrot.slane %v1365_v47, 2 }
 0x61e   :  { %v1373_v50 = vmax.f32 %v1371_v46, %v1372_v48  ;;  %v1283_v46 = vmax.f32 %v3653_v57, 0.0  ;;  %v1282_v48 = vmax.f32 %v3656_v60, 0.0 }
 0x61f   :  { %v1367_v51 = vmax.f32 %v1365_v47, %v1366_v49 }
 0x620   :  { %v1374_v52 = vrot.slane %v1373_v50, 1  ;;  %v1321_v47 = vmax.f32 %v1283_v46, %v3665_v13  ;;  %v1869_v46 = vld [vmem:[%s3953_s5 + $0x188] sm:$0xff] }
 0x621   :  { %v1368_v61 = vrot.slane %v1367_v51, 1 }
 0x622   :  { %v1375_v62 = vmax.f32 %v1373_v50, %v1374_v52  ;;  %v1359_v50 = vmax.f32 %v1321_v47, %v3714_v30  ;;  %v1868_v47 = vld [vmem:[%s3953_s5 + $0x180] sm:$0xff] }
 0x623   :  { %v1369_v0 = vmax.f32 %v1367_v51, %v1368_v61  ;;  %v1320_v51 = vmax.f32 %v1282_v48, %v3668_v38  ;;  %v2722_v48 = vld [vmem:[%s3953_s5 + $0x178] ss:$0 sm:$0xff] }
 0x624   :  { %vm1377_vm1 = vcmp.eq.f32.partialorder %v1363_v34, %v1375_v62 }
 0x625   :  { %vm1376_vm13 = vcmp.eq.f32.partialorder %v1362_v40, %v1369_v0  ;;  %v1379_v10 = vsel %vm1377_vm1, %v3638_v31, 8.0  ;;  %v1358_v62 = vmax.f32 %v1320_v51, %v3717_v33 }
 0x626   :  { %v1378_v18 = vsel %vm1376_vm13, %v3638_v31, 8.0  ;;  %v1386_v19 = vrot.slane %v1379_v10, 4 }
 0x627   :  { %v1380_v21 = vrot.slane %v1378_v18, 4 }
 0x628   :  { %v1387_v22 = vmin.f32 %v1379_v10, %v1386_v19 }
 0x629   :  { %v1381_v6 = vmin.f32 %v1378_v18, %v1380_v21 }
 0x62a   :  { %v1388_v7 = vrot.slane %v1387_v22, 2 }
 0x62b   :  { %v1382_v23 = vrot.slane %v1381_v6, 2 }
 0x62c   :  { %v1389_v9 = vmin.f32 %v1387_v22, %v1388_v7  ;;  %v1988_v7 = vld [vmem:[%s3953_s5 + $0x218] sm:$0xff] }
 0x62d   :  { %v1383_v26 = vmin.f32 %v1381_v6, %v1382_v23  ;;  %v1987_v23 = vld [vmem:[%s3953_s5 + $0x210] sm:$0xff] }
 0x62e   :  { %v1390_v29 = vrot.slane %v1389_v9, 1 }
 0x62f   :  { %v1384_v40 = vrot.slane %v1383_v26, 1 }
 0x630   :  { %v1391_v41 = vmin.f32 %v1389_v9, %v1390_v29  ;;  %v1986_v9 = vld [vmem:[%s3953_s5 + $0x208] sm:$0xff]  ;;  %v1875_v29 = vld [vmem:[%s3953_s5 + $0x1b8] sm:$0xff] }
 0x631   :  { %v1385_v42 = vmin.f32 %v1383_v26, %v1384_v40  ;;  %v2168_v26 = vld [vmem:[%s3953_s5 + $0x290] sm:$0xff]  ;;  %2996 = vmatprep.subr.mxu1 %v1875_v29  ;;  %v1873_v40 = vld [vmem:[%s3953_s5 + $0x1a8] sm:$0xff] }
 0x632   :  { %vm1393_vm14 = vcmp.eq.f32.partialorder %v3638_v31, %v1391_v41  ;;  %2997 = vmatpush3.msra.mxu1 %v1875_v29  ;;  %v1871_v41 = vld [vmem:[%s3953_s5 + $0x198] sm:$0xff] }
 0x633   :  { %vm1392_vm15 = vcmp.eq.f32.partialorder %v3638_v31, %v1385_v42  ;;  %v1395_v49 = vsel %vm1393_vm14, 1.0, %v3259_v3  ;;  %v1870_v42 = vld [vmem:[%s3953_s5 + $0x190] sm:$0xff] }
 0x634   :  { %v1394_v61 = vsel %vm1392_vm15, 1.0, %v3259_v3  ;;  %v3736_v57 = vmax.f32 %v1359_v50, %v1395_v49 }
 0x635   :  { %v3739_v60 = vmax.f32 %v1358_v62, %v1394_v61 }
 0x6a1   :  { %v2976_v1 = vpop.f32.mrf.mxu1 }
 0x6a2   :  { %v1702_v11 = vadd.f32 %v2976_v1, %v2719_v63 }
 0x6a3   :  { %v1696_v39 = vpop.f32.mrf.mxu1 }
 0x6a4   :  { %v1706_v2 = vsub.f32 0.0, %v1702_v11  ;;  %v1697_v4 = vadd.f32 %v2719_v63, %v1696_v39 }
 0x6a6   :  { %v1709_v15 = vmul.f32 1.442695, %v1706_v2  ;;  %v1705_v17 = vsub.f32 0.0, %v1697_v4 }
 0x6a8   :  { %3178 = vpow2.f32 %v1709_v15  ;;  %v1707_v20 = vmul.f32 1.442695, %v1705_v17 }
 0x6aa   :  { %3180 = vpow2.f32 %v1707_v20 }
 0x6b5   :  { %v3179_v24 = vpop.eup %3178 }
 0x6b6   :  { %v1712_v25 = vadd.f32 1.0, %v3179_v24  ;;  %v2174_v24 = vld [vmem:[%s3953_s5 + $0x2c0] sm:$0xff] }
 0x6b7   :  { %v3181_v27 = vpop.eup %3180 }
 0x6b8   :  { %3182 = vrcp.f32 %v1712_v25  ;;  %v1711_v34 = vadd.f32 1.0, %v3181_v27  ;;  %v2171_v25 = vld [vmem:[%s3953_s5 + $0x2a8] sm:$0xff] }
 0x6b9   :  { %v2167_v27 = vld [vmem:[%s3953_s5 + $0x288] sm:$0xff] }
 0x6ba   :  { %3184 = vrcp.f32 %v1711_v34  ;;  %v1874_v34 = vld [vmem:[%s3953_s5 + $0x1b0] sm:$0xff] }
 0x6bb   :  { %2998 = vmatprep.subr.mxu1 %v1874_v34 }
 0x6bc   :  { %2999 = vmatpush3.msra.mxu1 %v1874_v34 }
 0x6bd   :  { %3000 = vmatprep.subr.mxu1 %v1873_v40 }
 0x6be   :  { %3001 = vmatpush3.msra.mxu1 %v1873_v40  ;;  %v2253_v40 = vld [vmem:[%s3953_s5 + $0x2d0] sm:$0xff] }
 0x6c5   :  { %v3183_v52 = vpop.eup %3182 }
 0x6c6   :  { %v1718_v63 = vmul.f32 %v3183_v52, %v1702_v11 }
 0x6c7   :  { %v3185_v0 = vpop.eup %3184 }
 0x6c8   :  { %v1720_v13 = vmul.f32 %v1718_v63, %v3736_v57  ;;  %v1717_v31 = vmul.f32 %v3185_v0, %v1697_v4 }
 0x6ca   :  { %v1728_v1 = vsel %vm1515_vm12, %v1720_v13, 0.0  ;;  %v1719_v30 = vmul.f32 %v1717_v31, %v3739_v60 }
 0x6cb   :  { %v1729_v39 = vrot.slane %v1728_v1, 4 }
 0x6cc   :  { %v1721_v38 = vsel %vm1515_vm12, %v1719_v30, 0.0 }
 0x6cd   :  { %v1730_v2 = vadd.f32 %v1729_v39, %v1728_v1  ;;  %v1722_v3 = vrot.slane %v1721_v38, 4 }
 0x6cf   :  { %v1731_v10 = vrot.slane %v1730_v2, 2  ;;  %v1723_v33 = vadd.f32 %v1722_v3, %v1721_v38 }
 0x6d1   :  { %v1732_v15 = vadd.f32 %v1731_v10, %v1730_v2  ;;  %v1724_v17 = vrot.slane %v1723_v33, 2 }
 0x6d3   :  { %v1733_v11 = vrot.slane %v1732_v15, 1  ;;  %v1725_v18 = vadd.f32 %v1724_v17, %v1723_v33  ;;  %v1985_v33 = vld [vmem:[%s3953_s5 + $0x200] sm:$0xff]  ;;  %v1979_v17 = vld [vmem:[%s3953_s5 + $0x1d0] sm:$0xff] }
 0x6d5   :  { %v1726_v19 = vrot.slane %v1725_v18, 1  ;;  %v1734_v20 = vadd.f32 %v1733_v11, %v1732_v15  ;;  %v1980_v15 = vld [vmem:[%s3953_s5 + $0x1d8] sm:$0xff]  ;;  %v1978_v11 = vld [vmem:[%s3953_s5 + $0x1c8] sm:$0xff] }
 0x6d7   :  { %v1727_v21 = vadd.f32 %v1726_v19, %v1725_v18  ;;  %v1736_v22 = vmul.f32 0.25, %v1734_v20  ;;  %v2254_v18 = vld [vmem:[%s3953_s5 + $0x2d8] sm:$0xff]  ;;  %v2724_v19 = vld [vmem:[%s3953_s5 + $0x1c0] ss:$0 sm:$0xff] }
 0x6d9   :  { %v1735_v4 = vmul.f32 0.25, %v1727_v21 }
 0x6db   :  { %v1753_v6 = vsel %vm1752_vm2, %v1736_v22, %v1735_v4 }
 0x6dc   :  { %2994 = vmatmul.mubr.msk.f32.vlgmr.msra.gmra.mxu0 %vm1515_vm12, %v1753_v6 }
 0x6dd   :  { %3016 = vmatpush3.msra.mxu0 %v3705_v5  ;;  %3023 = vmatprep.mubr.msk.f32.mxu0 %vm1019_vm10, %v3558_v16  ;;  %v2173_v16 = vld [vmem:[%s3953_s5 + $0x2b8] sm:$0xff]  ;;  %v2172_v5 = vld [vmem:[%s3953_s5 + $0x2b0] sm:$0xff] }
 0x6de   :  { %3017 = vmatprep.subr.mxu0 %v1988_v7 }
 0x6df   :  { %3018 = vmatpush3.msra.mxu0 %v1988_v7 }
 0x6e0   :  { %3019 = vmatprep.subr.mxu0 %v1987_v23 }
 0x6e1   :  { %3020 = vmatpush3.msra.mxu0 %v1987_v23 }
 0x6e2   :  { %3021 = vmatprep.subr.mxu0 %v1986_v9 }
 0x6e3   :  { %3022 = vmatpush3.msra.mxu0 %v1986_v9 }
 0x6e4   :  { %3024 = vmatmul.mubr.msk.f32.vlgmr.msra.gmra.mxu0 %vm1019_vm10, %v3556_v12  ;;  %3045 = vmatprep.subr.mxu0 %v2174_v24  ;;  %v2170_v12 = vld [vmem:[%s3953_s5 + $0x2a0] sm:$0xff] }
 0x6e5   :  { %3046 = vmatpush3.msra.mxu0 %v2174_v24  ;;  %3061 = vmatprep.mubr.msk.f32.mxu0 %vm1515_vm12, %v3596_v43  ;;  %v2169_v43 = vld [vmem:[%s3953_s5 + $0x298] sm:$0xff] }
 0x6e6   :  { %3047 = vmatprep.subr.mxu0 %v2173_v16 }
 0x6e7   :  { %3048 = vmatpush3.msra.mxu0 %v2173_v16 }
 0x6e8   :  { %3049 = vmatprep.subr.mxu0 %v2172_v5 }
 0x6e9   :  { %3050 = vmatpush3.msra.mxu0 %v2172_v5 }
 0x6ea   :  { %3051 = vmatprep.subr.mxu0 %v2171_v25 }
 0x6eb   :  { %3052 = vmatpush3.msra.mxu0 %v2171_v25 }
 0x6ec   :  { %3053 = vmatprep.subr.mxu0 %v2170_v12 }
 0x6ed   :  { %3054 = vmatpush3.msra.mxu0 %v2170_v12 }
 0x6ee   :  { %3055 = vmatprep.subr.mxu0 %v2169_v43 }
 0x6ef   :  { %3056 = vmatpush3.msra.mxu0 %v2169_v43 }
 0x6f0   :  { %3057 = vmatprep.subr.mxu0 %v2168_v26 }
 0x6f1   :  { %3058 = vmatpush3.msra.mxu0 %v2168_v26 }
 0x6f2   :  { %3059 = vmatprep.subr.mxu0 %v2167_v27 }
 0x6f3   :  { %3060 = vmatpush3.msra.mxu0 %v2167_v27 }
 0x6f4   :  { %3062 = vmatmul.mubr.msk.f32.vlgmr.msra.gmra.mxu0 %vm1515_vm12, %v3598_v44  ;;  %v1872_v44 = vld [vmem:[%s3953_s5 + $0x1a0] sm:$0xff] }
 0x6f5   :  { %3002 = vmatprep.subr.mxu1 %v1872_v44 }
 0x6f6   :  { %3003 = vmatpush3.msra.mxu1 %v1872_v44  ;;  %v2252_v44 = vld [vmem:[%s3953_s5 + $0x2c8] sm:$0xff] }
 0x6f7   :  { %3004 = vmatprep.subr.mxu1 %v1871_v41 }
 0x6f8   :  { %3005 = vmatpush3.msra.mxu1 %v1871_v41  ;;  %v2450_v41 = vld [vmem:[%s3953_s5 + $0x2f0] sm:$0xff] }
 0x6f9   :  { %3006 = vmatprep.subr.mxu1 %v1870_v42 }
 0x6fa   :  { %3007 = vmatpush3.msra.mxu1 %v1870_v42  ;;  %v2448_v42 = vld [vmem:[%s3953_s5 + $0x2e0] sm:$0xff] }
 0x6fb   :  { %3008 = vmatprep.subr.mxu1 %v1869_v46 }
 0x6fc   :  { %3009 = vmatpush3.msra.mxu1 %v1869_v46  ;;  %v2344_v46 = vld [vmem:[%s3953_s5 + $0x240] sm:$0xff] }
 0x6fd   :  { %3010 = vmatprep.subr.mxu1 %v1868_v47 }
 0x6fe   :  { %3011 = vmatpush3.msra.mxu1 %v1868_v47  ;;  %v2343_v47 = vld [vmem:[%s3953_s5 + $0x238] sm:$0xff] }
 0x6ff   :  { %3026 = vmatprep.subr.mxu1 %v1985_v33 }
 0x79c   :  { %v1822_v49 = vpop.f32.mrf.mxu0 }
 0x79d   :  { %v1823_v50 = vadd.f32 %v2722_v48, %v1822_v49  ;;  %v2342_v48 = vld [vmem:[%s3953_s5 + $0x230] sm:$0xff]  ;;  %v2553_v49 = vld [vmem:[%s3953_s5 + $0x300] sm:$0xf] }
 0x79e   :  { %v2995_v51 = vpop.f32.mrf.mxu0 }
 0x79f   :  { %v1826_v52 = vsub.f32 0.0, %v1823_v50 }
 0x7a1   :  { %v1827_v61 = vmul.f32 1.442695, %v1826_v52 }
 0x7a3   :  { %3186 = vpow2.f32 %v1827_v61 }
 0x7b0   :  { %v3187_v62 = vpop.eup %3186 }
 0x7b1   :  { %v1829_v63 = vadd.f32 1.0, %v3187_v62  ;;  %v2731_v62 = vld [vmem:[%s3953_s5 + $0x228] ss:$0 sm:$0xff] }
 0x7b3   :  { %3188 = vrcp.f32 %v1829_v63 }
 0x7c0   :  { %v3189_v0 = vpop.eup %3188 }
 0x7c1   :  { %v1832_v13 = vmul.f32 %v3189_v0, %v1823_v50  ;;  %v3025_v50 = vpop.f32.mrf.mxu0 }
 0x7c3   :  { %v1840_v31 = vrot.slane %v1832_v13, %v3424_v14  ;;  %v2056_v51 = vpop.f32.mrf.mxu0 }
 0x7c5   :  { %v1841_v1 = vcombine.high %v1840_v31, %v1840_v31  ;;  %v1848_v30 = vrot.slane %v1840_v31, %v3424_v14  ;;  %v3063_v52 = vpop.f32.mrf.mxu0 }
 0x7c7   :  { %v1855_v39 = vrot.slane %v1841_v1, %v3424_v14  ;;  %v1859_v38 = vrot.slane %v1848_v30, %v3434_v28  ;;  %v1984_v14 = vld [vmem:[%s3953_s5 + $0x1f8] sm:$0xff]  ;;  %v2241_v1 = vpop.f32.mrf.mxu0 }
 0x7c9   :  { %v1863_v2 = vrot.slane %v1855_v39, %v3434_v28  ;;  %v1866_v3 = vadd.f32 %v1859_v38, %v3640_v36  ;;  %v1983_v28 = vld [vmem:[%s3953_s5 + $0x1f0] sm:$0xff]  ;;  %v1982_v36 = vld [vmem:[%s3953_s5 + $0x1e8] sm:$0xff]  ;;  %v2251_v38 = vmul.f32 %v3063_v52, %v3736_v57 }
 0x7cb   :  { %3012 = vmatprep.mubr.msk.f32.mxu1 %vm1515_vm12, %v1866_v3  ;;  %v1867_v10 = vadd.f32 %v1863_v2, %v3643_v37  ;;  %v1981_v37 = vld [vmem:[%s3953_s5 + $0x1e0] sm:$0xff]  ;;  %v2250_v3 = vmul.f32 %v2241_v1, %v3739_v60 }
 0x7cd   :  { %3013 = vmatmul.mubr.msk.f32.vlgmr.msra.gmra.mxu1 %vm1515_vm12, %v1867_v10 }
 0x7ce   :  { %3027 = vmatpush3.msra.mxu1 %v1985_v33 }
 0x7cf   :  { %3028 = vmatprep.subr.mxu1 %v1984_v14 }
 0x7d0   :  { %3029 = vmatpush3.msra.mxu1 %v1984_v14 }
 0x7d1   :  { %3030 = vmatprep.subr.mxu1 %v1983_v28 }
 0x7d2   :  { %3031 = vmatpush3.msra.mxu1 %v1983_v28 }
 0x7d3   :  { %3032 = vmatprep.subr.mxu1 %v1982_v36 }
 0x7d4   :  { %3033 = vmatpush3.msra.mxu1 %v1982_v36 }
 0x7d5   :  { %3034 = vmatprep.subr.mxu1 %v1981_v37 }
 0x7d6   :  { %3035 = vmatpush3.msra.mxu1 %v1981_v37 }
 0x7d7   :  { %3036 = vmatprep.subr.mxu1 %v1980_v15 }
 0x7d8   :  { %3037 = vmatpush3.msra.mxu1 %v1980_v15 }
 0x7d9   :  { %3038 = vmatprep.subr.mxu1 %v1979_v17 }
 0x7da   :  { %3039 = vmatpush3.msra.mxu1 %v1979_v17 }
 0x7db   :  { %3040 = vmatprep.subr.mxu1 %v1978_v11 }
 0x7dc   :  { %3041 = vmatpush3.msra.mxu1 %v1978_v11 }
 0x7dd   :  { %3064 = vmatprep.subr.mxu1 %v2254_v18 }
 0x88d   :  { %v3014_v20 = vpop.f32.mrf.mxu1 }
 0x88e   :  { %v1959_v21 = vadd.f32 %v3014_v20, %v2724_v19 }
 0x88f   :  { %v1953_v4 = vpop.f32.mrf.mxu1 }
 0x890   :  { %v1963_v22 = vsub.f32 0.0, %v1959_v21  ;;  %v1954_v6 = vadd.f32 %v2724_v19, %v1953_v4 }
 0x892   :  { %v1966_v7 = vmul.f32 1.442695, %v1963_v22  ;;  %v1962_v23 = vsub.f32 0.0, %v1954_v6 }
 0x894   :  { %3190 = vpow2.f32 %v1966_v7  ;;  %v1964_v9 = vmul.f32 1.442695, %v1962_v23 }
 0x896   :  { %3192 = vpow2.f32 %v1964_v9 }
 0x8a1   :  { %v3191_v24 = vpop.eup %3190 }
 0x8a2   :  { %v1969_v16 = vadd.f32 1.0, %v3191_v24 }
 0x8a3   :  { %v3193_v5 = vpop.eup %3192 }
 0x8a4   :  { %3194 = vrcp.f32 %v1969_v16  ;;  %v1968_v25 = vadd.f32 1.0, %v3193_v5 }
 0x8a6   :  { %3196 = vrcp.f32 %v1968_v25 }
 0x8b1   :  { %v3195_v12 = vpop.eup %3194 }
 0x8b2   :  { %v1975_v26 = vmul.f32 %v3195_v12, %v1959_v21 }
 0x8b3   :  { %v3197_v43 = vpop.eup %3196 }
 0x8b4   :  { %v1974_v27 = vmul.f32 %v3197_v43, %v1954_v6  ;;  %v1977_v34 = vmul.f32 %v1975_v26, %v3736_v57  ;;  %v2552_v6 = vld [vmem:[%s3953_s5 + $0x2f8] sm:$0xff] }
 0x8b6   :  { %v1976_v29 = vmul.f32 %v1974_v27, %v3739_v60 }
 0x8b8   :  { %3042 = vmatprep.mubr.msk.f32.mxu1 %vm1515_vm12, %v1976_v29 }
 0x8b9   :  { %3043 = vmatmul.mubr.msk.f32.vlgmr.msra.gmra.mxu1 %vm1515_vm12, %v1977_v34 }
 0x8ba   :  { %3065 = vmatpush3.msra.mxu1 %v2254_v18  ;;  %3070 = vmatprep.mubr.msk.f32.mxu1 %vm1159_vm11, %v3632_v59  ;;  %v2449_v59 = vld [vmem:[%s3953_s5 + $0x2e8] sm:$0xff] }
 0x8bb   :  { %3066 = vmatprep.subr.mxu1 %v2253_v40 }
 0x8bc   :  { %3067 = vmatpush3.msra.mxu1 %v2253_v40 }
 0x8bd   :  { %3068 = vmatprep.subr.mxu1 %v2252_v44 }
 0x8be   :  { %3069 = vmatpush3.msra.mxu1 %v2252_v44 }
 0x8bf   :  { %3071 = vmatmul.mubr.msk.f32.vlgmr.msra.gmra.mxu1 %vm1159_vm11, %v3630_v58  ;;  %3084 = vmatprep.subr.mxu1 %v2450_v41  ;;  %v2345_v58 = vld [vmem:[%s3953_s5 + $0x248] sm:$0xff] }
 0x8c0   :  { %3085 = vmatpush3.msra.mxu1 %v2450_v41  ;;  %3073 = vmatprep.subr.mxu0 %v2345_v58 }
 0x8c1   :  { %3086 = vmatprep.subr.mxu1 %v2449_v59  ;;  %3074 = vmatpush3.msra.mxu0 %v2345_v58 }
 0x8c2   :  { %3087 = vmatpush3.msra.mxu1 %v2449_v59  ;;  %3075 = vmatprep.subr.mxu0 %v2344_v46 }
 0x8c3   :  { %3088 = vmatprep.subr.mxu1 %v2448_v42  ;;  %3076 = vmatpush3.msra.mxu0 %v2344_v46 }
 0x8c4   :  { %3089 = vmatpush3.msra.mxu1 %v2448_v42  ;;  %3077 = vmatprep.subr.mxu0 %v2343_v47 }
 0x8c5   :  { %3078 = vmatpush3.msra.mxu0 %v2343_v47 }
 0x8c6   :  { %3079 = vmatprep.subr.mxu0 %v2342_v48 }
 0x8c7   :  { %3080 = vmatpush3.msra.mxu0 %v2342_v48 }
 0x8c8   :  { %3093 = vmatprep.subr.msk.mxu0 %vm255_vm0, %v2553_v49 }
 0x979   :  { %v3044_v61 = vpop.f32.mrf.mxu1 }
 0x97a   :  { %v2143_v63 = vadd.f32 %v3044_v61, %v3025_v50 }
 0x97b   :  { %v2137_v0 = vpop.f32.mrf.mxu1 }
 0x97c   :  { %v2152_v13 = vadd.f32 %v2731_v62, %v2143_v63  ;;  %v2138_v31 = vadd.f32 %v2137_v0, %v2056_v51 }
 0x97e   :  { %v2154_v30 = vsub.f32 0.0, %v2152_v13  ;;  %v2151_v39 = vadd.f32 %v2731_v62, %v2138_v31 }
 0x97f   :  { %v3072_v2 = vpop.f32.mrf.mxu1 }
 0x980   :  { %v2157_v10 = vmul.f32 1.442695, %v2154_v30  ;;  %v2153_v33 = vsub.f32 0.0, %v2151_v39  ;;  %v2337_v14 = vadd.f32 %v3072_v2, %v2251_v38 }
 0x981   :  { %v2327_v28 = vpop.f32.mrf.mxu1 }
 0x982   :  { %3198 = vpow2.f32 %v2157_v10  ;;  %v2155_v36 = vmul.f32 1.442695, %v2153_v33  ;;  %v2336_v37 = vadd.f32 %v2327_v28, %v2250_v3  ;;  %v2341_v17 = vadd.f32 %v3544_v55, %v2337_v14 }
 0x983   :  { %v2550_v55 = vmul.f32 %v3542_v54, %v3493_v35 }
 0x984   :  { %3200 = vpow2.f32 %v2155_v36  ;;  %v2340_v15 = vadd.f32 %v2336_v37, %v3546_v56 }
 0x986   :  { %3090 = vmatprep.mubr.msk.f32.mxu1 %vm1159_vm11, %v2340_v15 }
 0x987   :  { %3091 = vmatmul.mubr.msk.f32.vlgmr.msra.gmra.mxu1 %vm1159_vm11, %v2341_v17 }
 0x98f   :  { %v3199_v57 = vpop.eup %3198 }
 0x990   :  { %v2160_v11 = vadd.f32 1.0, %v3199_v57 }
 0x991   :  { %v3201_v18 = vpop.eup %3200 }
 0x992   :  { %3202 = vrcp.f32 %v2160_v11  ;;  %v2159_v60 = vadd.f32 1.0, %v3201_v18 }
 0x994   :  { %3204 = vrcp.f32 %v2159_v60 }
 0x99f   :  { %v3203_v19 = vpop.eup %3202 }
 0x9a0   :  { %v2166_v21 = vmul.f32 %v3203_v19, %v2152_v13 }
 0x9a1   :  { %v3205_v20 = vpop.eup %3204 }
 0x9a2   :  { %v2165_v4 = vmul.f32 %v3205_v20, %v2151_v39  ;;  %v2339_v56 = vadd.f32 %v2166_v21, %v3515_v45 }
 0x9a4   :  { %v2338_v22 = vadd.f32 %v2165_v4, %v3511_v8  ;;  %v2551_v8 = vmul.f32 %v3540_v53, %v3488_v32 }
 0x9a6   :  { %3081 = vmatprep.mubr.msk.f32.mxu0 %vm1019_vm10, %v2338_v22 }
 0x9a7   :  { %3082 = vmatmul.mubr.msk.f32.vlgmr.msra.gmra.mxu0 %vm1019_vm10, %v2339_v56 }
 0x9a8   :  { %3094 = vmatpush3.msk.msra.mxu0 %vm255_vm0, %v2553_v49  ;;  %3097 = vmatprep.mubr.msk.f32.mxu0 %vm523_vm5, %v2550_v55 }
 0x9a9   :  { %3095 = vmatprep.subr.mxu0 %v2552_v6 }
 0x9aa   :  { %3096 = vmatpush3.msra.mxu0 %v2552_v6 }
 0x9ab   :  { %3098 = vmatmul.mubr.msk.f32.vlgmr.msra.gmra.mxu0 %vm523_vm5, %v2551_v8 }
 0x9ac   :  { %3225 = shalt.err (!%p3222_p4)
}
 0x9ad   :  { %s3274_s21 = smov 128   ;;  %s3275_s22 = smov 8   ;;  %v2736_v45 = vld [vmem:[%s3953_s5 + $0x250] ss:$0 sm:$0xff] }
 0x9ae   :  { %2653 = dma.vmem_to_hbm [thread:$0]  %s2648_s20, 256, %s3955_s7, [#allocation3], %s3274_s21, %s3274_s21, %s3275_s22  }
 0x9af   :  { %s3276_s5 = smov [#allocation4]  }
 0x9b0   :  { %s2659_s12 = sshll.u32 %s3276_s5, 4  ;;  %s2660_s12 = int_to_ptr.vmem [resolvable:$true] %s2659_s12 }
 0x9b1   :  { %s3234_s13 = scalar_lea.vmem %s2660_s12, 256  ;;  %p3239_p6 = scmp.lt.s32.totalorder %s2660_s12, %s2660_s12 }
 0x9b2   :  { %p3235_p5 = scmp.ne.s32.totalorder %s2660_s12, %s3234_s13  ;;  %p3240_p7 = scmp.lt.s32.totalorder %s3234_s13, %s3234_s13 }
 0x9b4   :  { %p3241_p8 = por %p3240_p7, %p3239_p6 }
 0x9b6   :  { %p3242_p9 = pnand %p3241_p8, %p3235_p5 }
 0xa47   :  { %v3092_v32 = vpop.f32.mrf.mxu1 }
 0xa48   :  { %2533 = vst.msk [vmem:[%s3957_s9 + $0x8] sm:$0xff] %vm523_vm5, %v3092_v32 }
 0xa49   :  { %v2523_v35 = vpop.f32.mrf.mxu1 }
 0xa4a   :  { %2532 = vst.msk [vmem:[%s3957_s9] sm:$0xff] %vm523_vm5, %v2523_v35 }
 0xa67   :  { %v3083_v53 = vpop.f32.mrf.mxu0 }
 0xa68   :  { %v2429_v54 = vadd.f32 %v3083_v53, %v2736_v45 }
 0xa69   :  { %v2423_v7 = vpop.f32.mrf.mxu0 }
 0xa6a   :  { %v2433_v23 = vsub.f32 0.0, %v2429_v54  ;;  %v2424_v9 = vadd.f32 %v2736_v45, %v2423_v7 }
 0xa6b   :  { %v3099_v24 = vpop.f32.mrf.mxu0 }
 0xa6c   :  { %v2436_v16 = vmul.f32 1.442695, %v2433_v23  ;;  %v2432_v5 = vsub.f32 0.0, %v2424_v9  ;;  %2639 = vst.msk [vmem:[%s3954_s6 + $0x8] sm:$0xff] %vm700_vm9, %v3099_v24 }
 0xa6d   :  { %v2629_v25 = vpop.f32.mrf.mxu0 }
 0xa6e   :  { %3206 = vpow2.f32 %v2436_v16  ;;  %v2434_v12 = vmul.f32 1.442695, %v2432_v5  ;;  %2638 = vst.msk [vmem:[%s3954_s6] sm:$0xff] %vm700_vm9, %v2629_v25 }
 0xa70   :  { %3208 = vpow2.f32 %v2434_v12 }
 0xa7b   :  { %v3207_v43 = vpop.eup %3206 }
 0xa7c   :  { %v2439_v26 = vadd.f32 1.0, %v3207_v43 }
 0xa7d   :  { %v3209_v27 = vpop.eup %3208 }
 0xa7e   :  { %3210 = vrcp.f32 %v2439_v26  ;;  %v2438_v29 = vadd.f32 1.0, %v3209_v27 }
 0xa80   :  { %3212 = vrcp.f32 %v2438_v29 }
 0xa8b   :  { %v3211_v34 = vpop.eup %3210 }
 0xa8c   :  { %v2445_v40 = vmul.f32 %v3211_v34, %v2429_v54 }
 0xa8d   :  { %v3213_v44 = vpop.eup %3212 }
 0xa8e   :  { %2447 = vst.msk [vmem:[#allocation4 + $0x8] sm:$0xff] %vm790_vm6, %v2445_v40  ;;  %v2444_v41 = vmul.f32 %v3213_v44, %v2424_v9 }
 0xa90   :  { %2446 = vst.msk [vmem:[#allocation4] sm:$0xff] %vm790_vm6, %v2444_v41 }
 0xa91   :  { %3245 = shalt.err (!%p3242_p9)
}
 0xa92   :  { %2665 = dma.vmem_to_hbm [thread:$0]  %s2660_s12, 256, %s3956_s8, [#allocation5], %s3274_s21, %s3274_s21, %s3275_s22  }
 0xa93   :  { %3254 = dma.done.wait [#allocation3], 256  }
 0xa94   :  { %3255 = vsyncadd [#allocation3], 4294967040 }
 0xa95   :  { %3256 = dma.done.wait [#allocation5], 256  }
 0xa96   :  { %3257 = vsyncadd [#allocation5], 4294967040 }
 0xa97   :  { %2678 = vsyncpa [#allocation3], 1 }
 0xa98   :  { %2679 = vsyncpa [#allocation5], 1 }

</bundles_post_ra>
